<compile_context>
chip_gen: v7x
topology: tpu7x:2x2x1
jax: 0.10.0
libtpu: 0.0.40
codegen_flags: <defaults>
</compile_context>

<pallas_src>
import math
import functools

import jax
import jax.numpy as jnp
from jax.experimental import pallas as pl
from jax.experimental.pallas import tpu as pltpu


_VMEM_LIMIT = 32 * 1024 * 1024  # safe on v5e/v6e (128 MiB) and v7x (64 MiB)


# ------------------------------ activations --------------------------------

def _act(x, name):
    if name is None:
        return x
    if name == "relu":
        return jnp.maximum(x, 0.0)
    if name == "silu":
        return x * jax.nn.sigmoid(x)
    if name == "gelu":
        # PyTorch nn.GELU default is the exact erf-based GELU.
        return jax.nn.gelu(x, approximate=False)
    raise ValueError(f"unsupported activation: {name}")


def _choose_time_tile(L_out):
    """Lane (time) tile size: whole length for small L, 128-multiples else."""
    if L_out % 128 == 0:
        for cand in (512, 256, 128):
            if L_out % cand == 0:
                return cand
    return L_out


# -------------------------- fused Conv1d kernel -----------------------------

def _make_conv_kernel(K, stride, dilation, TL, n_l_tiles, pre_act, post_act):
    # tap -> (stride phase, offset within phase)
    taps = [((k * dilation) % stride, (k * dilation) // stride) for k in range(K)]

    def kernel(x_ref, w_ref, b_ref, o_ref):
        if n_l_tiles == 1:
            l0 = 0  # fully static slicing when there is a single time tile
        else:
            l0 = pl.multiple_of(pl.program_id(1) * TL, TL)
        acc = None
        for k, (phase, off) in enumerate(taps):
            xs = x_ref[0, phase, :, pl.ds(l0 + off, TL)]          # (C_in, TL)
            xs = _act(xs, pre_act)
            t = jnp.dot(w_ref[k], xs, preferred_element_type=jnp.float32)
            acc = t if acc is None else acc + t
        y = acc + b_ref[...]
        y = _act(y, post_act)
        o_ref[0] = y.astype(o_ref.dtype)

    return kernel


def conv1d_fused(x, w_taps, bias, *, stride=1, padding=0, dilation=1,
                 pre_act=None, post_act=None):
    """PyTorch-equivalent Conv1d (NCL) with fused pre/post activation.

    x:      (B, C_in, L)
    w_taps: (K, C_out, C_in)    -- torch weight (C_out, C_in, K) transposed
    bias:   (C_out, 1)
    """
    B, C_in, L = x.shape
    K, C_out, _ = w_taps.shape
    s = stride

    L_out = (L + 2 * padding - dilation * (K - 1) - 1) // s + 1
    L_pad = L + 2 * padding
    Lp = -(-L_pad // s)                       # ceil(L_pad / s)
    extra = Lp * s - L_pad
    xp = jnp.pad(x, ((0, 0), (0, 0), (padding, padding + extra)))
    # De-interleave by stride phase: (B, C, Lp, s) -> (B, s, C, Lp).
    xph = jnp.transpose(xp.reshape(B, C_in, Lp, s), (0, 3, 1, 2))

    TL = _choose_time_tile(L_out)
    n_l_tiles = L_out // TL
    grid = (B, n_l_tiles)

    kernel = _make_conv_kernel(K, s, dilation, TL, n_l_tiles, pre_act, post_act)
    b2 = bias.reshape(C_out, 1)

    trans = 0
    if pre_act in ("silu", "gelu"):
        trans += B * L_out * C_in * K
    if post_act in ("silu", "gelu"):
        trans += B * L_out * C_out
    cost = pl.CostEstimate(
        flops=2 * B * L_out * C_out * C_in * K,
        transcendentals=trans,
        bytes_accessed=4 * (xph.size + w_taps.size + b2.size + B * C_out * L_out),
    )

    return pl.pallas_call(
        kernel,
        grid=grid,
        in_specs=[
            pl.BlockSpec((1, s, C_in, Lp), lambda b, i: (b, 0, 0, 0)),
            pl.BlockSpec((K, C_out, C_in), lambda b, i: (0, 0, 0)),
            pl.BlockSpec((C_out, 1), lambda b, i: (0, 0)),
        ],
        out_specs=pl.BlockSpec((1, C_out, TL), lambda b, i: (b, 0, i)),
        out_shape=jax.ShapeDtypeStruct((B, C_out, L_out), x.dtype),
        compiler_params=pltpu.CompilerParams(
            dimension_semantics=("parallel", "parallel"),
            vmem_limit_bytes=_VMEM_LIMIT,
        ),
        cost_estimate=cost,
    )(xph, w_taps, b2)


# ---------------------- fused ResConv1DBlock kernel -------------------------

def _make_resblock_kernel(dilation, TL, n_l_tiles, act_name):
    d = dilation

    def kernel(x_ref, w1_ref, b1_ref, w2_ref, b2_ref, o_ref):
        if n_l_tiles == 1:
            l0 = 0
        else:
            l0 = pl.multiple_of(pl.program_id(1) * TL, TL)
        acc = None
        for k in range(3):  # dilated k=3 conv; act(0)=0 so padded zeros are safe
            xs = _act(x_ref[0, :, pl.ds(l0 + k * d, TL)], act_name)   # (C, TL)
            t = jnp.dot(w1_ref[k], xs, preferred_element_type=jnp.float32)
            acc = t if acc is None else acc + t
        h = _act(acc + b1_ref[...], act_name)
        y = jnp.dot(w2_ref[...], h, preferred_element_type=jnp.float32) + b2_ref[...]
        res = x_ref[0, :, pl.ds(l0 + d, TL)]                          # raw residual
        o_ref[0] = (y + res).astype(o_ref.dtype)

    return kernel


def resblock_fused(x, w1_taps, b1, w2_mat, b2, *, dilation, act_name):
    """Fused ResConv1DBlock: act -> conv(k=3, dil=d, pad=d) -> act -> conv(k=1) -> +x."""
    B, C, L = x.shape
    d = dilation
    Lp = L + 2 * d
    xp = jnp.pad(x, ((0, 0), (0, 0), (d, d)))

    TL = _choose_time_tile(L)
    n_l_tiles = L // TL
    grid = (B, n_l_tiles)

    kernel = _make_resblock_kernel(d, TL, n_l_tiles, act_name)
    b1r = b1.reshape(C, 1)
    b2r = b2.reshape(C, 1)

    trans = 2 * B * L * C * 4 if act_name in ("silu", "gelu") else 0
    cost = pl.CostEstimate(
        flops=2 * B * L * C * C * 4,          # k=3 conv + 1x1 conv
        transcendentals=trans,
        bytes_accessed=4 * (xp.size + w1_taps.size + w2_mat.size
                            + b1r.size + b2r.size + B * C * L),
    )

    return pl.pallas_call(
        kernel,
        grid=grid,
        in_specs=[
            pl.BlockSpec((1, C, Lp), lambda b, i: (b, 0, 0)),
            pl.BlockSpec((3, C, C), lambda b, i: (0, 0, 0)),
            pl.BlockSpec((C, 1), lambda b, i: (0, 0)),
            pl.BlockSpec((C, C), lambda b, i: (0, 0)),
            pl.BlockSpec((C, 1), lambda b, i: (0, 0)),
        ],
        out_specs=pl.BlockSpec((1, C, TL), lambda b, i: (b, 0, i)),
        out_shape=jax.ShapeDtypeStruct((B, C, L), x.dtype),
        compiler_params=pltpu.CompilerParams(
            dimension_semantics=("parallel", "parallel"),
            vmem_limit_bytes=_VMEM_LIMIT,
        ),
        cost_estimate=cost,
    )(xp, w1_taps, b1r, w2_mat, b2r)


# --------------------------- parameters / forward ---------------------------

def _init_conv(key, c_out, c_in, k):
    """PyTorch Conv1d default init; weights stored in kernel layout (K, C_out, C_in)."""
    kw, kb = jax.random.split(key)
    scale = 1.0 / math.sqrt(c_in * k)
    w = jax.random.uniform(kw, (c_out, c_in, k), jnp.float32, -scale, scale)
    b = jax.random.uniform(kb, (c_out,), jnp.float32, -scale, scale)
    return jnp.transpose(w, (2, 0, 1)), b.reshape(c_out, 1)


def build_params(key, cfg):
    H = cfg["hidden_size"]
    n_down = int(math.log2(cfg["down_sampling_ratio"]))
    filter_t = cfg["conv_stride"] * 2
    params = {}

    key, k0 = jax.random.split(key)
    params["conv_in"] = _init_conv(k0, H, cfg["motion_dim"], 3)

    params["down_blocks"] = []
    for _ in range(n_down):
        key, kd = jax.random.split(key)
        down = {"down_conv": _init_conv(kd, H, H, filter_t), "res_blocks": []}
        for _ in range(cfg["num_hidden_layers"]):
            key, k1, k2 = jax.random.split(key, 3)
            w1, b1 = _init_conv(k1, H, H, 3)     # conv1: k=3, pad=dilation
            w2, b2 = _init_conv(k2, H, H, 1)     # conv2: k=1
            down["res_blocks"].append(
                {"w1": w1, "b1": b1, "w2": w2[0], "b2": b2})
        params["down_blocks"].append(down)

    if cfg["codebook_dim"] != H:
        key, ko = jax.random.split(key)
        params["conv_out"] = _init_conv(ko, cfg["codebook_dim"], H, 3)
    return params


def motion_encoder_forward(params, x, cfg):
    # All structural hyper-parameters are static (derived from cfg), never traced.
    act = cfg["hidden_act"]
    stride = cfg["conv_stride"]
    pad_t = stride // 2
    growth = cfg["dilation_growth_rate"]
    # Resnet1D with reverse_dilation=True -> dilations growth**depth, reversed.
    dilations = [growth ** d for d in range(cfg["num_hidden_layers"])][::-1]

    # block 0: Conv1d(motion_dim -> hidden, 3, 1, 1) + ReLU (fused post-act)
    w, b = params["conv_in"]
    x = conv1d_fused(x, w, b, stride=1, padding=1, dilation=1, post_act="relu")

    # downsampling blocks: strided conv + Resnet1D (fully fused residual blocks)
    for down in params["down_blocks"]:
        w, b = down["down_conv"]
        x = conv1d_fused(x, w, b, stride=stride, padding=pad_t, dilation=1)
        for rb, d in zip(down["res_blocks"], dilations):
            x = resblock_fused(x, rb["w1"], rb["b1"], rb["w2"], rb["b2"],
                               dilation=d, act_name=act)

    # optional output projection if codebook_dim != hidden_size
    if "conv_out" in params:
        w, b = params["conv_out"]
        x = conv1d_fused(x, w, b, stride=1, padding=1, dilation=1)
    return x


# ----------------------------------- main -----------------------------------

if __name__ == "__main__":
    cfg = dict(
        motion_dim=4,
        hidden_size=32,
        conv_stride=2,
        down_sampling_ratio=2,   # -> one downsampling stage
        num_hidden_layers=2,
        dilation_growth_rate=2,
        hidden_act="relu",
        codebook_dim=16,
    )

    key = jax.random.PRNGKey(0)
    kp, kx = jax.random.split(key)
    params = build_params(kp, cfg)

    B, T = 2, 16
    x = jax.random.normal(kx, (B, cfg["motion_dim"], T), dtype=jnp.float32)

    fwd = jax.jit(functools.partial(motion_encoder_forward, cfg=cfg))
    out = fwd(params, x)
    jax.block_until_ready(out)

    expected = (B, cfg["codebook_dim"], T // cfg["down_sampling_ratio"])
    assert out.shape == expected, (out.shape, expected)
    assert bool(jnp.all(jnp.isfinite(out)))
    # TODO(synk): the optional LN/GN/BN norms and dropout of ResConv1DBlock are
    # unused by MotionEncoder (norm=None) and are not implemented here.
    print("KERNEL_OK")
</pallas_src>

<mosaic_0001>
module attributes {stable_mosaic.version = 11 : i64} {
  func.func @kernel(%arg0: i32, %arg1: i32, %arg2: memref<1x1x4x18xf32, #tpu.memory_space<vmem>>, %arg3: memref<3x32x4xf32, #tpu.memory_space<vmem>>, %arg4: memref<32x1xf32, #tpu.memory_space<vmem>>, %arg5: memref<1x32x16xf32, #tpu.memory_space<vmem>>) attributes {dimension_semantics = [#tpu.dimension_semantics<parallel>, #tpu.dimension_semantics<parallel>], iteration_bounds = array<i64: 2, 1>, scalar_prefetch = 0 : i64, scratch_operands = 0 : i64, tpu.core_type = #tpu.core_type<tc>, window_params = [{transform_indices = @transform_0, window_bounds = array<i64: 1, 1, 4, 18>}, {pipeline_mode = #tpu.pipeline_mode<synchronous>, transform_indices = @transform_1, window_bounds = array<i64: 3, 32, 4>}, {pipeline_mode = #tpu.pipeline_mode<synchronous>, transform_indices = @transform_2, window_bounds = array<i64: 32, 1>}, {transform_indices = @transform_3, window_bounds = array<i64: 1, 32, 16>}]} {
    %c0 = arith.constant 0 : index
    %c0_0 = arith.constant 0 : index
    %c0_1 = arith.constant 0 : index
    %c0_2 = arith.constant 0 : index
    %0 = vector.load %arg2[%c0, %c0_0, %c0_1, %c0_2] : memref<1x1x4x18xf32, #tpu.memory_space<vmem>>, vector<1x1x4x16xf32>
    %1 = vector.shape_cast %0 : vector<1x1x4x16xf32> to vector<4x16xf32>
    %c0_3 = arith.constant 0 : index
    %c0_4 = arith.constant 0 : index
    %c0_5 = arith.constant 0 : index
    %2 = vector.load %arg3[%c0_3, %c0_4, %c0_5] : memref<3x32x4xf32, #tpu.memory_space<vmem>>, vector<1x32x4xf32>
    %3 = vector.shape_cast %2 : vector<1x32x4xf32> to vector<32x4xf32>
    %cst = arith.constant dense<0.000000e+00> : vector<32x16xf32>
    %4 = tpu.matmul %3, %1, %cst {dimension_numbers = #tpu.dot_dimension_numbers<[1], [0], [0], [1], [0, 0, 1, 1], [], []>} : vector<32x4xf32>, vector<4x16xf32>, vector<32x16xf32> -> vector<32x16xf32>
    %c0_6 = arith.constant 0 : index
    %c0_7 = arith.constant 0 : index
    %c0_8 = arith.constant 0 : index
    %c1 = arith.constant 1 : index
    %5 = vector.load %arg2[%c0_6, %c0_7, %c0_8, %c1] : memref<1x1x4x18xf32, #tpu.memory_space<vmem>>, vector<1x1x4x16xf32>
    %6 = vector.shape_cast %5 : vector<1x1x4x16xf32> to vector<4x16xf32>
    %c1_9 = arith.constant 1 : index
    %c0_10 = arith.constant 0 : index
    %c0_11 = arith.constant 0 : index
    %7 = vector.load %arg3[%c1_9, %c0_10, %c0_11] : memref<3x32x4xf32, #tpu.memory_space<vmem>>, vector<1x32x4xf32>
    %8 = vector.shape_cast %7 : vector<1x32x4xf32> to vector<32x4xf32>
    %cst_12 = arith.constant dense<0.000000e+00> : vector<32x16xf32>
    %9 = tpu.matmul %8, %6, %cst_12 {dimension_numbers = #tpu.dot_dimension_numbers<[1], [0], [0], [1], [0, 0, 1, 1], [], []>} : vector<32x4xf32>, vector<4x16xf32>, vector<32x16xf32> -> vector<32x16xf32>
    %10 = arith.addf %4, %9 : vector<32x16xf32>
    %c0_13 = arith.constant 0 : index
    %c0_14 = arith.constant 0 : index
    %c0_15 = arith.constant 0 : index
    %c2 = arith.constant 2 : index
    %11 = vector.load %arg2[%c0_13, %c0_14, %c0_15, %c2] : memref<1x1x4x18xf32, #tpu.memory_space<vmem>>, vector<1x1x4x16xf32>
    %12 = vector.shape_cast %11 : vector<1x1x4x16xf32> to vector<4x16xf32>
    %c2_16 = arith.constant 2 : index
    %c0_17 = arith.constant 0 : index
    %c0_18 = arith.constant 0 : index
    %13 = vector.load %arg3[%c2_16, %c0_17, %c0_18] : memref<3x32x4xf32, #tpu.memory_space<vmem>>, vector<1x32x4xf32>
    %14 = vector.shape_cast %13 : vector<1x32x4xf32> to vector<32x4xf32>
    %cst_19 = arith.constant dense<0.000000e+00> : vector<32x16xf32>
    %15 = tpu.matmul %14, %12, %cst_19 {dimension_numbers = #tpu.dot_dimension_numbers<[1], [0], [0], [1], [0, 0, 1, 1], [], []>} : vector<32x4xf32>, vector<4x16xf32>, vector<32x16xf32> -> vector<32x16xf32>
    %16 = arith.addf %10, %15 : vector<32x16xf32>
    %c0_20 = arith.constant 0 : index
    %c0_21 = arith.constant 0 : index
    %17 = vector.load %arg4[%c0_20, %c0_21] : memref<32x1xf32, #tpu.memory_space<vmem>>, vector<32x1xf32>
    %18 = vector.broadcast %17 : vector<32x1xf32> to vector<32x16xf32>
    %19 = arith.addf %16, %18 : vector<32x16xf32>
    %cst_22 = arith.constant 0.000000e+00 : f32
    %20 = vector.broadcast %cst_22 : f32 to vector<32x16xf32>
    %21 = arith.maximumf %19, %20 : vector<32x16xf32>
    %c0_23 = arith.constant 0 : index
    %c0_24 = arith.constant 0 : index
    %c0_25 = arith.constant 0 : index
    %22 = vector.load %arg5[%c0_23, %c0_24, %c0_25] : memref<1x32x16xf32, #tpu.memory_space<vmem>>, vector<1x32x16xf32>
    %23 = vector.shape_cast %22 : vector<1x32x16xf32> to vector<32x16xf32>
    %24 = vector.shape_cast %21 : vector<32x16xf32> to vector<1x32x16xf32>
    tpu.vector_store %arg5[%c0_23, %c0_24, %c0_25], %24 {strides = array<i32>} : memref<1x32x16xf32, #tpu.memory_space<vmem>>, vector<1x32x16xf32>,
    return
  }
  func.func @transform_0(%arg0: i32, %arg1: i32) -> (i32, i32, i32, i32) {
    %c0_i32 = arith.constant 0 : i32
    %c0_i32_0 = arith.constant 0 : i32
    %c0_i32_1 = arith.constant 0 : i32
    %c0_i32_2 = arith.constant 0 : i32
    return %arg0, %c0_i32, %c0_i32_0, %c0_i32_1 : i32, i32, i32, i32
  }
  func.func @transform_1(%arg0: i32, %arg1: i32) -> (i32, i32, i32) {
    %c0_i32 = arith.constant 0 : i32
    %c0_i32_0 = arith.constant 0 : i32
    %c0_i32_1 = arith.constant 0 : i32
    %c0_i32_2 = arith.constant 0 : i32
    return %c0_i32, %c0_i32_0, %c0_i32_1 : i32, i32, i32
  }
  func.func @transform_2(%arg0: i32, %arg1: i32) -> (i32, i32) {
    %c0_i32 = arith.constant 0 : i32
    %c0_i32_0 = arith.constant 0 : i32
    %c0_i32_1 = arith.constant 0 : i32
    return %c0_i32, %c0_i32_0 : i32, i32
  }
  func.func @transform_3(%arg0: i32, %arg1: i32) -> (i32, i32, i32) {
    %c0_i32 = arith.constant 0 : i32
    %c0_i32_0 = arith.constant 0 : i32
    return %arg0, %c0_i32, %arg1 : i32, i32, i32
  }
}

module attributes {stable_mosaic.version = 11 : i64} {
  func.func @kernel(%arg0: i32, %arg1: i32, %arg2: memref<1x2x32x9xf32, #tpu.memory_space<vmem>>, %arg3: memref<4x32x32xf32, #tpu.memory_space<vmem>>, %arg4: memref<32x1xf32, #tpu.memory_space<vmem>>, %arg5: memref<1x32x8xf32, #tpu.memory_space<vmem>>) attributes {dimension_semantics = [#tpu.dimension_semantics<parallel>, #tpu.dimension_semantics<parallel>], iteration_bounds = array<i64: 2, 1>, scalar_prefetch = 0 : i64, scratch_operands = 0 : i64, tpu.core_type = #tpu.core_type<tc>, window_params = [{transform_indices = @transform_0, window_bounds = array<i64: 1, 2, 32, 9>}, {pipeline_mode = #tpu.pipeline_mode<synchronous>, transform_indices = @transform_1, window_bounds = array<i64: 4, 32, 32>}, {pipeline_mode = #tpu.pipeline_mode<synchronous>, transform_indices = @transform_2, window_bounds = array<i64: 32, 1>}, {transform_indices = @transform_3, window_bounds = array<i64: 1, 32, 8>}]} {
    %c0 = arith.constant 0 : index
    %c0_0 = arith.constant 0 : index
    %c0_1 = arith.constant 0 : index
    %c0_2 = arith.constant 0 : index
    %0 = vector.load %arg2[%c0, %c0_0, %c0_1, %c0_2] : memref<1x2x32x9xf32, #tpu.memory_space<vmem>>, vector<1x1x32x8xf32>
    %1 = vector.shape_cast %0 : vector<1x1x32x8xf32> to vector<32x8xf32>
    %c0_3 = arith.constant 0 : index
    %c0_4 = arith.constant 0 : index
    %c0_5 = arith.constant 0 : index
    %2 = vector.load %arg3[%c0_3, %c0_4, %c0_5] : memref<4x32x32xf32, #tpu.memory_space<vmem>>, vector<1x32x32xf32>
    %3 = vector.shape_cast %2 : vector<1x32x32xf32> to vector<32x32xf32>
    %cst = arith.constant dense<0.000000e+00> : vector<32x8xf32>
    %4 = tpu.matmul %3, %1, %cst {dimension_numbers = #tpu.dot_dimension_numbers<[1], [0], [0], [1], [0, 0, 1, 1], [], []>} : vector<32x32xf32>, vector<32x8xf32>, vector<32x8xf32> -> vector<32x8xf32>
    %c0_6 = arith.constant 0 : index
    %c1 = arith.constant 1 : index
    %c0_7 = arith.constant 0 : index
    %c0_8 = arith.constant 0 : index
    %5 = vector.load %arg2[%c0_6, %c1, %c0_7, %c0_8] : memref<1x2x32x9xf32, #tpu.memory_space<vmem>>, vector<1x1x32x8xf32>
    %6 = vector.shape_cast %5 : vector<1x1x32x8xf32> to vector<32x8xf32>
    %c1_9 = arith.constant 1 : index
    %c0_10 = arith.constant 0 : index
    %c0_11 = arith.constant 0 : index
    %7 = vector.load %arg3[%c1_9, %c0_10, %c0_11] : memref<4x32x32xf32, #tpu.memory_space<vmem>>, vector<1x32x32xf32>
    %8 = vector.shape_cast %7 : vector<1x32x32xf32> to vector<32x32xf32>
    %cst_12 = arith.constant dense<0.000000e+00> : vector<32x8xf32>
    %9 = tpu.matmul %8, %6, %cst_12 {dimension_numbers = #tpu.dot_dimension_numbers<[1], [0], [0], [1], [0, 0, 1, 1], [], []>} : vector<32x32xf32>, vector<32x8xf32>, vector<32x8xf32> -> vector<32x8xf32>
    %10 = arith.addf %4, %9 : vector<32x8xf32>
    %c0_13 = arith.constant 0 : index
    %c0_14 = arith.constant 0 : index
    %c0_15 = arith.constant 0 : index
    %c1_16 = arith.constant 1 : index
    %11 = vector.load %arg2[%c0_13, %c0_14, %c0_15, %c1_16] : memref<1x2x32x9xf32, #tpu.memory_space<vmem>>, vector<1x1x32x8xf32>
    %12 = vector.shape_cast %11 : vector<1x1x32x8xf32> to vector<32x8xf32>
    %c2 = arith.constant 2 : index
    %c0_17 = arith.constant 0 : index
    %c0_18 = arith.constant 0 : index
    %13 = vector.load %arg3[%c2, %c0_17, %c0_18] : memref<4x32x32xf32, #tpu.memory_space<vmem>>, vector<1x32x32xf32>
    %14 = vector.shape_cast %13 : vector<1x32x32xf32> to vector<32x32xf32>
    %cst_19 = arith.constant dense<0.000000e+00> : vector<32x8xf32>
    %15 = tpu.matmul %14, %12, %cst_19 {dimension_numbers = #tpu.dot_dimension_numbers<[1], [0], [0], [1], [0, 0, 1, 1], [], []>} : vector<32x32xf32>, vector<32x8xf32>, vector<32x8xf32> -> vector<32x8xf32>
    %16 = arith.addf %10, %15 : vector<32x8xf32>
    %c0_20 = arith.constant 0 : index
    %c1_21 = arith.constant 1 : index
    %c0_22 = arith.constant 0 : index
    %c1_23 = arith.constant 1 : index
    %17 = vector.load %arg2[%c0_20, %c1_21, %c0_22, %c1_23] : memref<1x2x32x9xf32, #tpu.memory_space<vmem>>, vector<1x1x32x8xf32>
    %18 = vector.shape_cast %17 : vector<1x1x32x8xf32> to vector<32x8xf32>
    %c3 = arith.constant 3 : index
    %c0_24 = arith.constant 0 : index
    %c0_25 = arith.constant 0 : index
    %19 = vector.load %arg3[%c3, %c0_24, %c0_25] : memref<4x32x32xf32, #tpu.memory_space<vmem>>, vector<1x32x32xf32>
    %20 = vector.shape_cast %19 : vector<1x32x32xf32> to vector<32x32xf32>
    %cst_26 = arith.constant dense<0.000000e+00> : vector<32x8xf32>
    %21 = tpu.matmul %20, %18, %cst_26 {dimension_numbers = #tpu.dot_dimension_numbers<[1], [0], [0], [1], [0, 0, 1, 1], [], []>} : vector<32x32xf32>, vector<32x8xf32>, vector<32x8xf32> -> vector<32x8xf32>
    %22 = arith.addf %16, %21 : vector<32x8xf32>
    %c0_27 = arith.constant 0 : index
    %c0_28 = arith.constant 0 : index
    %23 = vector.load %arg4[%c0_27, %c0_28] : memref<32x1xf32, #tpu.memory_space<vmem>>, vector<32x1xf32>
    %24 = vector.broadcast %23 : vector<32x1xf32> to vector<32x8xf32>
    %25 = arith.addf %22, %24 : vector<32x8xf32>
    %c0_29 = arith.constant 0 : index
    %c0_30 = arith.constant 0 : index
    %c0_31 = arith.constant 0 : index
    %26 = vector.load %arg5[%c0_29, %c0_30, %c0_31] : memref<1x32x8xf32, #tpu.memory_space<vmem>>, vector<1x32x8xf32>
    %27 = vector.shape_cast %26 : vector<1x32x8xf32> to vector<32x8xf32>
    %28 = vector.shape_cast %25 : vector<32x8xf32> to vector<1x32x8xf32>
    tpu.vector_store %arg5[%c0_29, %c0_30, %c0_31], %28 {strides = array<i32>} : memref<1x32x8xf32, #tpu.memory_space<vmem>>, vector<1x32x8xf32>,
    return
  }
  func.func @transform_0(%arg0: i32, %arg1: i32) -> (i32, i32, i32, i32) {
    %c0_i32 = arith.constant 0 : i32
    %c0_i32_0 = arith.constant 0 : i32
    %c0_i32_1 = arith.constant 0 : i32
    %c0_i32_2 = arith.constant 0 : i32
    return %arg0, %c0_i32, %c0_i32_0, %c0_i32_1 : i32, i32, i32, i32
  }
  func.func @transform_1(%arg0: i32, %arg1: i32) -> (i32, i32, i32) {
    %c0_i32 = arith.constant 0 : i32
    %c0_i32_0 = arith.constant 0 : i32
    %c0_i32_1 = arith.constant 0 : i32
    %c0_i32_2 = arith.constant 0 : i32
    return %c0_i32, %c0_i32_0, %c0_i32_1 : i32, i32, i32
  }
  func.func @transform_2(%arg0: i32, %arg1: i32) -> (i32, i32) {
    %c0_i32 = arith.constant 0 : i32
    %c0_i32_0 = arith.constant 0 : i32
    %c0_i32_1 = arith.constant 0 : i32
    return %c0_i32, %c0_i32_0 : i32, i32
  }
  func.func @transform_3(%arg0: i32, %arg1: i32) -> (i32, i32, i32) {
    %c0_i32 = arith.constant 0 : i32
    %c0_i32_0 = arith.constant 0 : i32
    return %arg0, %c0_i32, %arg1 : i32, i32, i32
  }
}

module attributes {stable_mosaic.version = 11 : i64} {
  func.func @kernel(%arg0: i32, %arg1: i32, %arg2: memref<1x32x10xf32, #tpu.memory_space<vmem>>, %arg3: memref<3x32x32xf32, #tpu.memory_space<vmem>>, %arg4: memref<32x1xf32, #tpu.memory_space<vmem>>, %arg5: memref<32x32xf32, #tpu.memory_space<vmem>>, %arg6: memref<32x1xf32, #tpu.memory_space<vmem>>, %arg7: memref<1x32x8xf32, #tpu.memory_space<vmem>>) attributes {dimension_semantics = [#tpu.dimension_semantics<parallel>, #tpu.dimension_semantics<parallel>], iteration_bounds = array<i64: 2, 1>, scalar_prefetch = 0 : i64, scratch_operands = 0 : i64, tpu.core_type = #tpu.core_type<tc>, window_params = [{transform_indices = @transform_0, window_bounds = array<i64: 1, 32, 10>}, {pipeline_mode = #tpu.pipeline_mode<synchronous>, transform_indices = @transform_1, window_bounds = array<i64: 3, 32, 32>}, {pipeline_mode = #tpu.pipeline_mode<synchronous>, transform_indices = @transform_2, window_bounds = array<i64: 32, 1>}, {pipeline_mode = #tpu.pipeline_mode<synchronous>, transform_indices = @transform_3, window_bounds = array<i64: 32, 32>}, {pipeline_mode = #tpu.pipeline_mode<synchronous>, transform_indices = @transform_4, window_bounds = array<i64: 32, 1>}, {transform_indices = @transform_5, window_bounds = array<i64: 1, 32, 8>}]} {
    %c0 = arith.constant 0 : index
    %c0_0 = arith.constant 0 : index
    %c0_1 = arith.constant 0 : index
    %0 = vector.load %arg2[%c0, %c0_0, %c0_1] : memref<1x32x10xf32, #tpu.memory_space<vmem>>, vector<1x32x8xf32>
    %1 = vector.shape_cast %0 : vector<1x32x8xf32> to vector<32x8xf32>
    %cst = arith.constant 0.000000e+00 : f32
    %2 = vector.broadcast %cst : f32 to vector<32x8xf32>
    %3 = arith.maximumf %1, %2 : vector<32x8xf32>
    %c0_2 = arith.constant 0 : index
    %c0_3 = arith.constant 0 : index
    %c0_4 = arith.constant 0 : index
    %4 = vector.load %arg3[%c0_2, %c0_3, %c0_4] : memref<3x32x32xf32, #tpu.memory_space<vmem>>, vector<1x32x32xf32>
    %5 = vector.shape_cast %4 : vector<1x32x32xf32> to vector<32x32xf32>
    %cst_5 = arith.constant dense<0.000000e+00> : vector<32x8xf32>
    %6 = tpu.matmul %5, %3, %cst_5 {dimension_numbers = #tpu.dot_dimension_numbers<[1], [0], [0], [1], [0, 0, 1, 1], [], []>} : vector<32x32xf32>, vector<32x8xf32>, vector<32x8xf32> -> vector<32x8xf32>
    %c0_6 = arith.constant 0 : index
    %c0_7 = arith.constant 0 : index
    %c1 = arith.constant 1 : index
    %7 = vector.load %arg2[%c0_6, %c0_7, %c1] : memref<1x32x10xf32, #tpu.memory_space<vmem>>, vector<1x32x8xf32>
    %8 = vector.shape_cast %7 : vector<1x32x8xf32> to vector<32x8xf32>
    %cst_8 = arith.constant 0.000000e+00 : f32
    %9 = vector.broadcast %cst_8 : f32 to vector<32x8xf32>
    %10 = arith.maximumf %8, %9 : vector<32x8xf32>
    %c1_9 = arith.constant 1 : index
    %c0_10 = arith.constant 0 : index
    %c0_11 = arith.constant 0 : index
    %11 = vector.load %arg3[%c1_9, %c0_10, %c0_11] : memref<3x32x32xf32, #tpu.memory_space<vmem>>, vector<1x32x32xf32>
    %12 = vector.shape_cast %11 : vector<1x32x32xf32> to vector<32x32xf32>
    %cst_12 = arith.constant dense<0.000000e+00> : vector<32x8xf32>
    %13 = tpu.matmul %12, %10, %cst_12 {dimension_numbers = #tpu.dot_dimension_numbers<[1], [0], [0], [1], [0, 0, 1, 1], [], []>} : vector<32x32xf32>, vector<32x8xf32>, vector<32x8xf32> -> vector<32x8xf32>
    %14 = arith.addf %6, %13 : vector<32x8xf32>
    %c0_13 = arith.constant 0 : index
    %c0_14 = arith.constant 0 : index
    %c2 = arith.constant 2 : index
    %15 = vector.load %arg2[%c0_13, %c0_14, %c2] : memref<1x32x10xf32, #tpu.memory_space<vmem>>, vector<1x32x8xf32>
    %16 = vector.shape_cast %15 : vector<1x32x8xf32> to vector<32x8xf32>
    %cst_15 = arith.constant 0.000000e+00 : f32
    %17 = vector.broadcast %cst_15 : f32 to vector<32x8xf32>
    %18 = arith.maximumf %16, %17 : vector<32x8xf32>
    %c2_16 = arith.constant 2 : index
    %c0_17 = arith.constant 0 : index
    %c0_18 = arith.constant 0 : index
    %19 = vector.load %arg3[%c2_16, %c0_17, %c0_18] : memref<3x32x32xf32, #tpu.memory_space<vmem>>, vector<1x32x32xf32>
    %20 = vector.shape_cast %19 : vector<1x32x32xf32> to vector<32x32xf32>
    %cst_19 = arith.constant dense<0.000000e+00> : vector<32x8xf32>
    %21 = tpu.matmul %20, %18, %cst_19 {dimension_numbers = #tpu.dot_dimension_numbers<[1], [0], [0], [1], [0, 0, 1, 1], [], []>} : vector<32x32xf32>, vector<32x8xf32>, vector<32x8xf32> -> vector<32x8xf32>
    %22 = arith.addf %14, %21 : vector<32x8xf32>
    %c0_20 = arith.constant 0 : index
    %c0_21 = arith.constant 0 : index
    %23 = vector.load %arg4[%c0_20, %c0_21] : memref<32x1xf32, #tpu.memory_space<vmem>>, vector<32x1xf32>
    %24 = vector.broadcast %23 : vector<32x1xf32> to vector<32x8xf32>
    %25 = arith.addf %22, %24 : vector<32x8xf32>
    %cst_22 = arith.constant 0.000000e+00 : f32
    %26 = vector.broadcast %cst_22 : f32 to vector<32x8xf32>
    %27 = arith.maximumf %25, %26 : vector<32x8xf32>
    %c0_23 = arith.constant 0 : index
    %c0_24 = arith.constant 0 : index
    %28 = vector.load %arg5[%c0_23, %c0_24] : memref<32x32xf32, #tpu.memory_space<vmem>>, vector<32x32xf32>
    %cst_25 = arith.constant dense<0.000000e+00> : vector<32x8xf32>
    %29 = tpu.matmul %28, %27, %cst_25 {dimension_numbers = #tpu.dot_dimension_numbers<[1], [0], [0], [1], [0, 0, 1, 1], [], []>} : vector<32x32xf32>, vector<32x8xf32>, vector<32x8xf32> -> vector<32x8xf32>
    %c0_26 = arith.constant 0 : index
    %c0_27 = arith.constant 0 : index
    %30 = vector.load %arg6[%c0_26, %c0_27] : memref<32x1xf32, #tpu.memory_space<vmem>>, vector<32x1xf32>
    %31 = vector.broadcast %30 : vector<32x1xf32> to vector<32x8xf32>
    %32 = arith.addf %29, %31 : vector<32x8xf32>
    %c0_28 = arith.constant 0 : index
    %c0_29 = arith.constant 0 : index
    %c1_30 = arith.constant 1 : index
    %33 = vector.load %arg2[%c0_28, %c0_29, %c1_30] : memref<1x32x10xf32, #tpu.memory_space<vmem>>, vector<1x32x8xf32>
    %34 = vector.shape_cast %33 : vector<1x32x8xf32> to vector<32x8xf32>
    %35 = arith.addf %32, %34 : vector<32x8xf32>
    %c0_31 = arith.constant 0 : index
    %c0_32 = arith.constant 0 : index
    %c0_33 = arith.constant 0 : index
    %36 = vector.load %arg7[%c0_31, %c0_32, %c0_33] : memref<1x32x8xf32, #tpu.memory_space<vmem>>, vector<1x32x8xf32>
    %37 = vector.shape_cast %36 : vector<1x32x8xf32> to vector<32x8xf32>
    %38 = vector.shape_cast %35 : vector<32x8xf32> to vector<1x32x8xf32>
    tpu.vector_store %arg7[%c0_31, %c0_32, %c0_33], %38 {strides = array<i32>} : memref<1x32x8xf32, #tpu.memory_space<vmem>>, vector<1x32x8xf32>,
    return
  }
  func.func @transform_0(%arg0: i32, %arg1: i32) -> (i32, i32, i32) {
    %c0_i32 = arith.constant 0 : i32
    %c0_i32_0 = arith.constant 0 : i32
    %c0_i32_1 = arith.constant 0 : i32
    return %arg0, %c0_i32, %c0_i32_0 : i32, i32, i32
  }
  func.func @transform_1(%arg0: i32, %arg1: i32) -> (i32, i32, i32) {
    %c0_i32 = arith.constant 0 : i32
    %c0_i32_0 = arith.constant 0 : i32
    %c0_i32_1 = arith.constant 0 : i32
    %c0_i32_2 = arith.constant 0 : i32
    return %c0_i32, %c0_i32_0, %c0_i32_1 : i32, i32, i32
  }
  func.func @transform_2(%arg0: i32, %arg1: i32) -> (i32, i32) {
    %c0_i32 = arith.constant 0 : i32
    %c0_i32_0 = arith.constant 0 : i32
    %c0_i32_1 = arith.constant 0 : i32
    return %c0_i32, %c0_i32_0 : i32, i32
  }
  func.func @transform_3(%arg0: i32, %arg1: i32) -> (i32, i32) {
    %c0_i32 = arith.constant 0 : i32
    %c0_i32_0 = arith.constant 0 : i32
    %c0_i32_1 = arith.constant 0 : i32
    return %c0_i32, %c0_i32_0 : i32, i32
  }
  func.func @transform_4(%arg0: i32, %arg1: i32) -> (i32, i32) {
    %c0_i32 = arith.constant 0 : i32
    %c0_i32_0 = arith.constant 0 : i32
    %c0_i32_1 = arith.constant 0 : i32
    return %c0_i32, %c0_i32_0 : i32, i32
  }
  func.func @transform_5(%arg0: i32, %arg1: i32) -> (i32, i32, i32) {
    %c0_i32 = arith.constant 0 : i32
    %c0_i32_0 = arith.constant 0 : i32
    return %arg0, %c0_i32, %arg1 : i32, i32, i32
  }
}

module attributes {stable_mosaic.version = 11 : i64} {
  func.func @kernel(%arg0: i32, %arg1: i32, %arg2: memref<1x32x12xf32, #tpu.memory_space<vmem>>, %arg3: memref<3x32x32xf32, #tpu.memory_space<vmem>>, %arg4: memref<32x1xf32, #tpu.memory_space<vmem>>, %arg5: memref<32x32xf32, #tpu.memory_space<vmem>>, %arg6: memref<32x1xf32, #tpu.memory_space<vmem>>, %arg7: memref<1x32x8xf32, #tpu.memory_space<vmem>>) attributes {dimension_semantics = [#tpu.dimension_semantics<parallel>, #tpu.dimension_semantics<parallel>], iteration_bounds = array<i64: 2, 1>, scalar_prefetch = 0 : i64, scratch_operands = 0 : i64, tpu.core_type = #tpu.core_type<tc>, window_params = [{transform_indices = @transform_0, window_bounds = array<i64: 1, 32, 12>}, {pipeline_mode = #tpu.pipeline_mode<synchronous>, transform_indices = @transform_1, window_bounds = array<i64: 3, 32, 32>}, {pipeline_mode = #tpu.pipeline_mode<synchronous>, transform_indices = @transform_2, window_bounds = array<i64: 32, 1>}, {pipeline_mode = #tpu.pipeline_mode<synchronous>, transform_indices = @transform_3, window_bounds = array<i64: 32, 32>}, {pipeline_mode = #tpu.pipeline_mode<synchronous>, transform_indices = @transform_4, window_bounds = array<i64: 32, 1>}, {transform_indices = @transform_5, window_bounds = array<i64: 1, 32, 8>}]} {
    %c0 = arith.constant 0 : index
    %c0_0 = arith.constant 0 : index
    %c0_1 = arith.constant 0 : index
    %0 = vector.load %arg2[%c0, %c0_0, %c0_1] : memref<1x32x12xf32, #tpu.memory_space<vmem>>, vector<1x32x8xf32>
    %1 = vector.shape_cast %0 : vector<1x32x8xf32> to vector<32x8xf32>
    %cst = arith.constant 0.000000e+00 : f32
    %2 = vector.broadcast %cst : f32 to vector<32x8xf32>
    %3 = arith.maximumf %1, %2 : vector<32x8xf32>
    %c0_2 = arith.constant 0 : index
    %c0_3 = arith.constant 0 : index
    %c0_4 = arith.constant 0 : index
    %4 = vector.load %arg3[%c0_2, %c0_3, %c0_4] : memref<3x32x32xf32, #tpu.memory_space<vmem>>, vector<1x32x32xf32>
    %5 = vector.shape_cast %4 : vector<1x32x32xf32> to vector<32x32xf32>
    %cst_5 = arith.constant dense<0.000000e+00> : vector<32x8xf32>
    %6 = tpu.matmul %5, %3, %cst_5 {dimension_numbers = #tpu.dot_dimension_numbers<[1], [0], [0], [1], [0, 0, 1, 1], [], []>} : vector<32x32xf32>, vector<32x8xf32>, vector<32x8xf32> -> vector<32x8xf32>
    %c0_6 = arith.constant 0 : index
    %c0_7 = arith.constant 0 : index
    %c2 = arith.constant 2 : index
    %7 = vector.load %arg2[%c0_6, %c0_7, %c2] : memref<1x32x12xf32, #tpu.memory_space<vmem>>, vector<1x32x8xf32>
    %8 = vector.shape_cast %7 : vector<1x32x8xf32> to vector<32x8xf32>
    %cst_8 = arith.constant 0.000000e+00 : f32
    %9 = vector.broadcast %cst_8 : f32 to vector<32x8xf32>
    %10 = arith.maximumf %8, %9 : vector<32x8xf32>
    %c1 = arith.constant 1 : index
    %c0_9 = arith.constant 0 : index
    %c0_10 = arith.constant 0 : index
    %11 = vector.load %arg3[%c1, %c0_9, %c0_10] : memref<3x32x32xf32, #tpu.memory_space<vmem>>, vector<1x32x32xf32>
    %12 = vector.shape_cast %11 : vector<1x32x32xf32> to vector<32x32xf32>
    %cst_11 = arith.constant dense<0.000000e+00> : vector<32x8xf32>
    %13 = tpu.matmul %12, %10, %cst_11 {dimension_numbers = #tpu.dot_dimension_numbers<[1], [0], [0], [1], [0, 0, 1, 1], [], []>} : vector<32x32xf32>, vector<32x8xf32>, vector<32x8xf32> -> vector<32x8xf32>
    %14 = arith.addf %6, %13 : vector<32x8xf32>
    %c0_12 = arith.constant 0 : index
    %c0_13 = arith.constant 0 : index
    %c4 = arith.constant 4 : index
    %15 = vector.load %arg2[%c0_12, %c0_13, %c4] : memref<1x32x12xf32, #tpu.memory_space<vmem>>, vector<1x32x8xf32>
    %16 = vector.shape_cast %15 : vector<1x32x8xf32> to vector<32x8xf32>
    %cst_14 = arith.constant 0.000000e+00 : f32
    %17 = vector.broadcast %cst_14 : f32 to vector<32x8xf32>
    %18 = arith.maximumf %16, %17 : vector<32x8xf32>
    %c2_15 = arith.constant 2 : index
    %c0_16 = arith.constant 0 : index
    %c0_17 = arith.constant 0 : index
    %19 = vector.load %arg3[%c2_15, %c0_16, %c0_17] : memref<3x32x32xf32, #tpu.memory_space<vmem>>, vector<1x32x32xf32>
    %20 = vector.shape_cast %19 : vector<1x32x32xf32> to vector<32x32xf32>
    %cst_18 = arith.constant dense<0.000000e+00> : vector<32x8xf32>
    %21 = tpu.matmul %20, %18, %cst_18 {dimension_numbers = #tpu.dot_dimension_numbers<[1], [0], [0], [1], [0, 0, 1, 1], [], []>} : vector<32x32xf32>, vector<32x8xf32>, vector<32x8xf32> -> vector<32x8xf32>
    %22 = arith.addf %14, %21 : vector<32x8xf32>
    %c0_19 = arith.constant 0 : index
    %c0_20 = arith.constant 0 : index
    %23 = vector.load %arg4[%c0_19, %c0_20] : memref<32x1xf32, #tpu.memory_space<vmem>>, vector<32x1xf32>
    %24 = vector.broadcast %23 : vector<32x1xf32> to vector<32x8xf32>
    %25 = arith.addf %22, %24 : vector<32x8xf32>
    %cst_21 = arith.constant 0.000000e+00 : f32
    %26 = vector.broadcast %cst_21 : f32 to vector<32x8xf32>
    %27 = arith.maximumf %25, %26 : vector<32x8xf32>
    %c0_22 = arith.constant 0 : index
    %c0_23 = arith.constant 0 : index
    %28 = vector.load %arg5[%c0_22, %c0_23] : memref<32x32xf32, #tpu.memory_space<vmem>>, vector<32x32xf32>
    %cst_24 = arith.constant dense<0.000000e+00> : vector<32x8xf32>
    %29 = tpu.matmul %28, %27, %cst_24 {dimension_numbers = #tpu.dot_dimension_numbers<[1], [0], [0], [1], [0, 0, 1, 1], [], []>} : vector<32x32xf32>, vector<32x8xf32>, vector<32x8xf32> -> vector<32x8xf32>
    %c0_25 = arith.constant 0 : index
    %c0_26 = arith.constant 0 : index
    %30 = vector.load %arg6[%c0_25, %c0_26] : memref<32x1xf32, #tpu.memory_space<vmem>>, vector<32x1xf32>
    %31 = vector.broadcast %30 : vector<32x1xf32> to vector<32x8xf32>
    %32 = arith.addf %29, %31 : vector<32x8xf32>
    %c0_27 = arith.constant 0 : index
    %c0_28 = arith.constant 0 : index
    %c2_29 = arith.constant 2 : index
    %33 = vector.load %arg2[%c0_27, %c0_28, %c2_29] : memref<1x32x12xf32, #tpu.memory_space<vmem>>, vector<1x32x8xf32>
    %34 = vector.shape_cast %33 : vector<1x32x8xf32> to vector<32x8xf32>
    %35 = arith.addf %32, %34 : vector<32x8xf32>
    %c0_30 = arith.constant 0 : index
    %c0_31 = arith.constant 0 : index
    %c0_32 = arith.constant 0 : index
    %36 = vector.load %arg7[%c0_30, %c0_31, %c0_32] : memref<1x32x8xf32, #tpu.memory_space<vmem>>, vector<1x32x8xf32>
    %37 = vector.shape_cast %36 : vector<1x32x8xf32> to vector<32x8xf32>
    %38 = vector.shape_cast %35 : vector<32x8xf32> to vector<1x32x8xf32>
    tpu.vector_store %arg7[%c0_30, %c0_31, %c0_32], %38 {strides = array<i32>} : memref<1x32x8xf32, #tpu.memory_space<vmem>>, vector<1x32x8xf32>,
    return
  }
  func.func @transform_0(%arg0: i32, %arg1: i32) -> (i32, i32, i32) {
    %c0_i32 = arith.constant 0 : i32
    %c0_i32_0 = arith.constant 0 : i32
    %c0_i32_1 = arith.constant 0 : i32
    return %arg0, %c0_i32, %c0_i32_0 : i32, i32, i32
  }
  func.func @transform_1(%arg0: i32, %arg1: i32) -> (i32, i32, i32) {
    %c0_i32 = arith.constant 0 : i32
    %c0_i32_0 = arith.constant 0 : i32
    %c0_i32_1 = arith.constant 0 : i32
    %c0_i32_2 = arith.constant 0 : i32
    return %c0_i32, %c0_i32_0, %c0_i32_1 : i32, i32, i32
  }
  func.func @transform_2(%arg0: i32, %arg1: i32) -> (i32, i32) {
    %c0_i32 = arith.constant 0 : i32
    %c0_i32_0 = arith.constant 0 : i32
    %c0_i32_1 = arith.constant 0 : i32
    return %c0_i32, %c0_i32_0 : i32, i32
  }
  func.func @transform_3(%arg0: i32, %arg1: i32) -> (i32, i32) {
    %c0_i32 = arith.constant 0 : i32
    %c0_i32_0 = arith.constant 0 : i32
    %c0_i32_1 = arith.constant 0 : i32
    return %c0_i32, %c0_i32_0 : i32, i32
  }
  func.func @transform_4(%arg0: i32, %arg1: i32) -> (i32, i32) {
    %c0_i32 = arith.constant 0 : i32
    %c0_i32_0 = arith.constant 0 : i32
    %c0_i32_1 = arith.constant 0 : i32
    return %c0_i32, %c0_i32_0 : i32, i32
  }
  func.func @transform_5(%arg0: i32, %arg1: i32) -> (i32, i32, i32) {
    %c0_i32 = arith.constant 0 : i32
    %c0_i32_0 = arith.constant 0 : i32
    return %arg0, %c0_i32, %arg1 : i32, i32, i32
  }
}

module attributes {stable_mosaic.version = 11 : i64} {
  func.func @kernel(%arg0: i32, %arg1: i32, %arg2: memref<1x1x32x10xf32, #tpu.memory_space<vmem>>, %arg3: memref<3x16x32xf32, #tpu.memory_space<vmem>>, %arg4: memref<16x1xf32, #tpu.memory_space<vmem>>, %arg5: memref<1x16x8xf32, #tpu.memory_space<vmem>>) attributes {dimension_semantics = [#tpu.dimension_semantics<parallel>, #tpu.dimension_semantics<parallel>], iteration_bounds = array<i64: 2, 1>, scalar_prefetch = 0 : i64, scratch_operands = 0 : i64, tpu.core_type = #tpu.core_type<tc>, window_params = [{transform_indices = @transform_0, window_bounds = array<i64: 1, 1, 32, 10>}, {pipeline_mode = #tpu.pipeline_mode<synchronous>, transform_indices = @transform_1, window_bounds = array<i64: 3, 16, 32>}, {pipeline_mode = #tpu.pipeline_mode<synchronous>, transform_indices = @transform_2, window_bounds = array<i64: 16, 1>}, {transform_indices = @transform_3, window_bounds = array<i64: 1, 16, 8>}]} {
    %c0 = arith.constant 0 : index
    %c0_0 = arith.constant 0 : index
    %c0_1 = arith.constant 0 : index
    %c0_2 = arith.constant 0 : index
    %0 = vector.load %arg2[%c0, %c0_0, %c0_1, %c0_2] : memref<1x1x32x10xf32, #tpu.memory_space<vmem>>, vector<1x1x32x8xf32>
    %1 = vector.shape_cast %0 : vector<1x1x32x8xf32> to vector<32x8xf32>
    %c0_3 = arith.constant 0 : index
    %c0_4 = arith.constant 0 : index
    %c0_5 = arith.constant 0 : index
    %2 = vector.load %arg3[%c0_3, %c0_4, %c0_5] : memref<3x16x32xf32, #tpu.memory_space<vmem>>, vector<1x16x32xf32>
    %3 = vector.shape_cast %2 : vector<1x16x32xf32> to vector<16x32xf32>
    %cst = arith.constant dense<0.000000e+00> : vector<16x8xf32>
    %4 = tpu.matmul %3, %1, %cst {dimension_numbers = #tpu.dot_dimension_numbers<[1], [0], [0], [1], [0, 0, 1, 1], [], []>} : vector<16x32xf32>, vector<32x8xf32>, vector<16x8xf32> -> vector<16x8xf32>
    %c0_6 = arith.constant 0 : index
    %c0_7 = arith.constant 0 : index
    %c0_8 = arith.constant 0 : index
    %c1 = arith.constant 1 : index
    %5 = vector.load %arg2[%c0_6, %c0_7, %c0_8, %c1] : memref<1x1x32x10xf32, #tpu.memory_space<vmem>>, vector<1x1x32x8xf32>
    %6 = vector.shape_cast %5 : vector<1x1x32x8xf32> to vector<32x8xf32>
    %c1_9 = arith.constant 1 : index
    %c0_10 = arith.constant 0 : index
    %c0_11 = arith.constant 0 : index
    %7 = vector.load %arg3[%c1_9, %c0_10, %c0_11] : memref<3x16x32xf32, #tpu.memory_space<vmem>>, vector<1x16x32xf32>
    %8 = vector.shape_cast %7 : vector<1x16x32xf32> to vector<16x32xf32>
    %cst_12 = arith.constant dense<0.000000e+00> : vector<16x8xf32>
    %9 = tpu.matmul %8, %6, %cst_12 {dimension_numbers = #tpu.dot_dimension_numbers<[1], [0], [0], [1], [0, 0, 1, 1], [], []>} : vector<16x32xf32>, vector<32x8xf32>, vector<16x8xf32> -> vector<16x8xf32>
    %10 = arith.addf %4, %9 : vector<16x8xf32>
    %c0_13 = arith.constant 0 : index
    %c0_14 = arith.constant 0 : index
    %c0_15 = arith.constant 0 : index
    %c2 = arith.constant 2 : index
    %11 = vector.load %arg2[%c0_13, %c0_14, %c0_15, %c2] : memref<1x1x32x10xf32, #tpu.memory_space<vmem>>, vector<1x1x32x8xf32>
    %12 = vector.shape_cast %11 : vector<1x1x32x8xf32> to vector<32x8xf32>
    %c2_16 = arith.constant 2 : index
    %c0_17 = arith.constant 0 : index
    %c0_18 = arith.constant 0 : index
    %13 = vector.load %arg3[%c2_16, %c0_17, %c0_18] : memref<3x16x32xf32, #tpu.memory_space<vmem>>, vector<1x16x32xf32>
    %14 = vector.shape_cast %13 : vector<1x16x32xf32> to vector<16x32xf32>
    %cst_19 = arith.constant dense<0.000000e+00> : vector<16x8xf32>
    %15 = tpu.matmul %14, %12, %cst_19 {dimension_numbers = #tpu.dot_dimension_numbers<[1], [0], [0], [1], [0, 0, 1, 1], [], []>} : vector<16x32xf32>, vector<32x8xf32>, vector<16x8xf32> -> vector<16x8xf32>
    %16 = arith.addf %10, %15 : vector<16x8xf32>
    %c0_20 = arith.constant 0 : index
    %c0_21 = arith.constant 0 : index
    %17 = vector.load %arg4[%c0_20, %c0_21] : memref<16x1xf32, #tpu.memory_space<vmem>>, vector<16x1xf32>
    %18 = vector.broadcast %17 : vector<16x1xf32> to vector<16x8xf32>
    %19 = arith.addf %16, %18 : vector<16x8xf32>
    %c0_22 = arith.constant 0 : index
    %c0_23 = arith.constant 0 : index
    %c0_24 = arith.constant 0 : index
    %20 = vector.load %arg5[%c0_22, %c0_23, %c0_24] : memref<1x16x8xf32, #tpu.memory_space<vmem>>, vector<1x16x8xf32>
    %21 = vector.shape_cast %20 : vector<1x16x8xf32> to vector<16x8xf32>
    %22 = vector.shape_cast %19 : vector<16x8xf32> to vector<1x16x8xf32>
    tpu.vector_store %arg5[%c0_22, %c0_23, %c0_24], %22 {strides = array<i32>} : memref<1x16x8xf32, #tpu.memory_space<vmem>>, vector<1x16x8xf32>,
    return
  }
  func.func @transform_0(%arg0: i32, %arg1: i32) -> (i32, i32, i32, i32) {
    %c0_i32 = arith.constant 0 : i32
    %c0_i32_0 = arith.constant 0 : i32
    %c0_i32_1 = arith.constant 0 : i32
    %c0_i32_2 = arith.constant 0 : i32
    return %arg0, %c0_i32, %c0_i32_0, %c0_i32_1 : i32, i32, i32, i32
  }
  func.func @transform_1(%arg0: i32, %arg1: i32) -> (i32, i32, i32) {
    %c0_i32 = arith.constant 0 : i32
    %c0_i32_0 = arith.constant 0 : i32
    %c0_i32_1 = arith.constant 0 : i32
    %c0_i32_2 = arith.constant 0 : i32
    return %c0_i32, %c0_i32_0, %c0_i32_1 : i32, i32, i32
  }
  func.func @transform_2(%arg0: i32, %arg1: i32) -> (i32, i32) {
    %c0_i32 = arith.constant 0 : i32
    %c0_i32_0 = arith.constant 0 : i32
    %c0_i32_1 = arith.constant 0 : i32
    return %c0_i32, %c0_i32_0 : i32, i32
  }
  func.func @transform_3(%arg0: i32, %arg1: i32) -> (i32, i32, i32) {
    %c0_i32 = arith.constant 0 : i32
    %c0_i32_0 = arith.constant 0 : i32
    return %arg0, %c0_i32, %arg1 : i32, i32, i32
  }
}

</mosaic_0001>

<bundles_post_ra>
// kernel: motion_encoder_forward.5
= control target key start
LH: loop header
LB: loop body
LE: loop exit
PB: predicated region body
PF: predicated region fallthrough
CT: control target
= control target key end

     0   :  { %s784_s12 = smov 0   ;;  %s786_s13 = smov 0   ;;  %s893_s0 = inlined_call_operand.vmem [shape: f32[2,1,4,18], index: 0, kind: input, shape index: {}]   ;;  %s894_s1 = inlined_call_operand.vmem [shape: f32[3,32,4], index: 1, kind: input, shape index: {}]   ;;  %s895_s2 = inlined_call_operand.vmem [shape: f32[32,1], index: 2, kind: input, shape index: {}]   ;;  %s896_s3 = inlined_call_operand.vmem [shape: f32[2,32,16], index: 3, kind: output, shape index: {}]  }
   0x1   :  { %s788_s14 = smov 0  }
   0x2 LB: > { %s25_s15 = sadd.s32 1, %s755_s13  ;;  %p629_p0 = scmp.ge.s32.totalorder %s759_s14, 1  ;;  %s759_s14 = sphi %s788_s14, %s13_s14   ;;  %s755_s13 = sphi %s786_s13, %s898_s13   ;;  %s751_s12 = sphi %s784_s12, %s897_s12  }
   0x3   : > { %p27_p1 = scmp.ge.s32.totalorder %s25_s15, 2  ;;  %p150_p2 = scmp.lt.s32.totalorder %s759_s14, 3 }
   0x5   : > { %s900_s15 = smov (%p27_p1, %s25_s15), 0  ;;  %p151_p3 = pnand %p629_p0, %p150_p2 }
   0x6   : > { %p176_p4 = scmp.lt.s32.totalorder (!%p151_p3), %s751_s12, 1  ;;  %v189_v0 = vld [vmem:[%s894_s1] sm:$0xff] (!%p151_p3)  ;;  %vm201_vm0 = vcmask (!%p151_p3), 31744   ;;  %vm214_vm1 = vcmask (!%p151_p3), 1043456   ;;  %v190_v3 = vld [vmem:[%s894_s1 + $0x8] sm:$0xff] (!%p151_p3)  ;;  %s761_s26 = smov (!%p151_p3), 127  }
   0x7   : > { %154 = sbr.rel (%p151_p3) target bundleno = 367 (0x16f), region = 32  ;;  %684 = vmatprep.mubr.msk.f32.mxu0 (!%p151_p3), %vm201_vm0, %v189_v0  ;;  %v633_v1 = vld [vmem:[%s894_s1 + $0x20] sm:$0xff] (!%p151_p3)  ;;  %v762_v6 = vmov (!%p151_p3), 0   ;;  %s763_s4 = smov (!%p151_p3), 126   ;;  %v512_v7 = vld [vmem:[%s895_s2 + $0x8] sm:$0xff] (!%p151_p3)  ;;  %v513_v8 = vld [vmem:[%s895_s2 + $0x10] sm:$0xff] (!%p151_p3) }
   0x8   : > { %676 = vmatprep.mubr.msk.f32.mxu1 (!%p151_p3), %vm201_vm0, %v633_v1  ;;  %v647_v4 = vld [vmem:[%s894_s1 + $0x40] sm:$0xff] (!%p151_p3)  ;;  %735 = vset.pattern.permute.xlu1 (!%p151_p3), %v762_v6  ;;  %v514_v9 = vld [vmem:[%s895_s2 + $0x18] sm:$0xff] (!%p151_p3)  ;;  %v634_v11 = vld [vmem:[%s894_s1 + $0x28] sm:$0xff] (!%p151_p3)  ;;  %vm543_vm2 = vcmask (!%p151_p3), 130048  }
   0x9   : > { %v511_v5 = vld [vmem:[%s895_s2] sm:$0xff] (!%p151_p3)  ;;  %736 = vset.pattern.permute.xlu0 (!%p151_p3), %v762_v6  ;;  %v635_v12 = vld [vmem:[%s894_s1 + $0x30] sm:$0xff] (!%p151_p3)  ;;  %v636_v14 = vld [vmem:[%s894_s1 + $0x38] sm:$0xff] (!%p151_p3) }
   0xa   : > { %517 = vperm.xlu1 (!%p151_p3), %735, %v511_v5   ;;  %v648_v15 = vld [vmem:[%s894_s1 + $0x48] sm:$0xff] (!%p151_p3)  ;;  %v191_v16 = vld [vmem:[%s894_s1 + $0x10] sm:$0xff] (!%p151_p3)  ;;  %v650_v18 = vld [vmem:[%s894_s1 + $0x58] sm:$0xff] (!%p151_p3) }
   0xb   : > { %v649_v17 = vld [vmem:[%s894_s1 + $0x50] sm:$0xff] (!%p151_p3)  ;;  %v192_v19 = vld [vmem:[%s894_s1 + $0x18] sm:$0xff] (!%p151_p3) }
   0xe   : > { %s902_s12 = smov (!%p176_p4, %s751_s12), 1  ;;  %522 = vperm.xlu1 %735, %v512_v7  }
   0xf   : > { %s630_s20 = sshll.u32 %s902_s12, 2 }
  0x10   : > { %s179_s23 = scalar_lea.vmem %s893_s0, %s630_s20 }
  0x11   : > { %v188_v2 = vld [vmem:[%s179_s23] sm:$0xf] }
  0x12   : > { %199 = vrot.lane.b32.xlu0 %v188_v2, %s761_s26  ;;  %682 = vmatprep.subr.msk.mxu0 %vm214_vm1, %v188_v2 }
  0x13   : > { %683 = vmatpush3.msk.msra.mxu0 %vm214_vm1, %v188_v2  ;;  %532 = vperm.xlu1 %735, %v514_v9  }
  0x14   : > { %685 = vmatmul.mubr.msk.f32.vlgmr.msra.gmra.mrb[0].mxu0 %vm201_vm0, %v190_v3 }
  0x15   : > { %692 = vmatprep.mubr.msk.f32.mxu0 %vm201_vm0, %v647_v4 }
  0x16   : > { %406 = vrot.lane.b32.xlu0 %v188_v2, %s763_s4  ;;  %s658_s4 = sshll.u32 %s902_s12, 5 }
  0x17   : > { %s187_s7 = scalar_lea.vmem %s896_s3, %s658_s4 }
  0x1a   : > { %527 = vperm.xlu0 %736, %v513_v8  }
  0x84   : > { %v200_v10 = vpop.permute.xlu0 %199 }
  0x85   : > { %674 = vmatprep.subr.msk.mxu1 %vm214_vm1, %v200_v10 }
  0x86   : > { %675 = vmatpush3.msk.msra.mxu1 %vm214_vm1, %v200_v10 }
  0x87   : > { %677 = vmatmul.mubr.msk.f32.vlgmr.msra.gmra.mrb[0].mxu1 %vm201_vm0, %v634_v11  ;;  %698 = vmatprep.subr.msk.mxu1 %vm214_vm1, %v188_v2 }
  0x88   : > { %v407_v13 = vpop.permute.xlu0 %406  ;;  %679 = vmatprep.mubr.msk.f32.mxu1 %vm201_vm0, %v635_v12  ;;  %699 = vmatpush3.msk.msra.mxu1 %vm214_vm1, %v188_v2 }
  0x89   : > { %690 = vmatprep.subr.msk.mxu0 %vm214_vm1, %v407_v13  ;;  %v518_v20 = vpop.permute.xlu1 %517 }
  0x8a   : > { %691 = vmatpush3.msk.msra.mxu0 %vm214_vm1, %v407_v13 }
  0x8b   : > { %680 = vmatmul.mubr.msk.f32.gmra.mrb[2].mxu1 %vm201_vm0, %v636_v14  ;;  %693 = vmatmul.mubr.msk.f32.vlgmr.msra.gmra.mrb[0].mxu0 %vm201_vm0, %v648_v15 }
  0x8c   : > { %687 = vmatprep.mubr.msk.f32.mxu1 %vm201_vm0, %v191_v16  ;;  %695 = vmatprep.mubr.msk.f32.mxu0 %vm201_vm0, %v649_v17 }
  0x8d   : > { %v523_v27 = vpop.permute.xlu1 %522 }
  0x8f   : > { %696 = vmatmul.mubr.msk.f32.gmra.mrb[2].mxu0 %vm201_vm0, %v650_v18 }
  0x92   : > { %v533_v38 = vpop.permute.xlu1 %532 }
  0x93   : > { %688 = vmatmul.mubr.msk.f32.vlgmr.msra.gmra.mrb[2].mxu1 %vm201_vm0, %v192_v19 }
  0x99   : > { %v528_v37 = vpop.permute.xlu0 %527 }
 0x15a   : > { %v678_v21 = vpop.f32.mrb[0].mxu1 }
 0x15b   : > { %v283_v22 = vpop.f32.mrb[1].mxu1 }
 0x15e   : > { %v694_v23 = vpop.f32.mrb[0].mxu0 }
 0x15f   : > { %v700_v24 = vadd.f32 %v694_v23, %v678_v21  ;;  %v488_v25 = vpop.f32.mrb[1].mxu0 }
 0x160   : > { %v701_v26 = vadd.f32 %v488_v25, %v283_v22 }
 0x161   : > { %v536_v28 = vadd.f32 %v700_v24, %v523_v27 }
 0x162   : > { %v535_v29 = vadd.f32 %v701_v26, %v518_v20  ;;  %v697_v30 = vpop.f32.mrb[2].mxu0 }
 0x163   : > { %v540_v31 = vmax.f32 %v536_v28, 0.0  ;;  %v498_v32 = vpop.f32.mrb[3].mxu0 }
 0x164   : > { %v539_v33 = vmax.f32 %v535_v29, 0.0 }
 0x165   : > { %545 = vst.msk [vmem:[%s187_s7 + $0x8] sm:$0xff] %vm543_vm2, %v540_v31 }
 0x166   : > { %544 = vst.msk [vmem:[%s187_s7] sm:$0xff] %vm543_vm2, %v539_v33  ;;  %v689_v34 = vpop.f32.mrb[2].mxu1 }
 0x167   : > { %v702_v35 = vadd.f32 %v697_v30, %v689_v34  ;;  %v392_v36 = vpop.f32.mrb[3].mxu1 }
 0x168   : > { %v703_v39 = vadd.f32 %v498_v32, %v392_v36 }
 0x169   : > { %v538_v40 = vadd.f32 %v702_v35, %v533_v38 }
 0x16a   : > { %v537_v41 = vadd.f32 %v703_v39, %v528_v37 }
 0x16b   : > { %v542_v42 = vmax.f32 %v538_v40, 0.0 }
 0x16c   : > { %v541_v43 = vmax.f32 %v537_v41, 0.0 }
 0x16d   : > { %547 = vst.msk [vmem:[%s187_s7 + $0x18] sm:$0xff] %vm543_vm2, %v542_v42 }
 0x16e   : > { %546 = vst.msk [vmem:[%s187_s7 + $0x10] sm:$0xff] %vm543_vm2, %v541_v43 }
 0x16f PF: > { %s13_s14 = sadd.s32 1, %s759_s14   ;;  %s897_s12 = smov %s755_s13 }
 0x170   : > { %p10_p5 = scmp.ge.s32.totalorder %s13_s14, 4   ;;  %s898_s13 = smov %s900_s15 }
 0x172   :  { %12 = sbr.rel (!%p10_p5) target bundleno = 2 (0x2), region = 64 }

// kernel: motion_encoder_forward.6
= control target key start
LH: loop header
LB: loop body
LE: loop exit
PB: predicated region body
PF: predicated region fallthrough
CT: control target
= control target key end

     0   :  { %s1029_s12 = smov 0   ;;  %s1031_s13 = smov 0   ;;  %s1142_s0 = inlined_call_operand.vmem [shape: f32[2,2,32,9], index: 0, kind: input, shape index: {}]   ;;  %s1143_s1 = inlined_call_operand.vmem [shape: f32[4,32,32], index: 1, kind: input, shape index: {}]   ;;  %s1144_s2 = inlined_call_operand.vmem [shape: f32[32,1], index: 2, kind: input, shape index: {}]   ;;  %s1145_s3 = inlined_call_operand.vmem [shape: f32[2,32,8], index: 3, kind: output, shape index: {}]  }
   0x1   :  { %s1033_s14 = smov 0  }
   0x2 LB: > { %s25_s15 = sadd.s32 1, %s1001_s13  ;;  %p762_p0 = scmp.ge.s32.totalorder %s1005_s14, 1  ;;  %s1005_s14 = sphi %s1033_s14, %s13_s14   ;;  %s1001_s13 = sphi %s1031_s13, %s1147_s13   ;;  %s997_s12 = sphi %s1029_s12, %s1146_s12  }
   0x3   : > { %p27_p1 = scmp.ge.s32.totalorder %s25_s15, 2  ;;  %p151_p2 = scmp.lt.s32.totalorder %s1005_s14, 3 }
   0x5   : > { %s1149_s15 = smov (%p27_p1, %s25_s15), 0  ;;  %p152_p3 = pnand %p762_p0, %p151_p2 }
   0x6   : > { %p178_p4 = scmp.lt.s32.totalorder (!%p152_p3), %s997_s12, 1  ;;  %v771_v0 = vld [vmem:[%s1143_s1 + $0x20] sm:$0xff] (!%p152_p3)  ;;  %vm209_vm0 = vcmask (!%p152_p3), 261120   ;;  %s1007_s24 = smov (!%p152_p3), 127   ;;  %v772_v17 = vld [vmem:[%s1143_s1 + $0x28] sm:$0xff] (!%p152_p3)  ;;  %v773_v18 = vld [vmem:[%s1143_s1 + $0x30] sm:$0xff] (!%p152_p3) }
   0x7   : > { %155 = sbr.rel (%p152_p3) target bundleno = 377 (0x179), region = 32  ;;  %843 = vmatprep.mubr.msk.f32.mxu1 (!%p152_p3), %vm209_vm0, %v771_v0  ;;  %v783_v1 = vld [vmem:[%s1143_s1 + $0x40] sm:$0xff] (!%p152_p3)  ;;  %v774_v20 = vld [vmem:[%s1143_s1 + $0x38] sm:$0xff] (!%p152_p3)  ;;  %v649_v22 = vld [vmem:[%s1144_s2 + $0x8] sm:$0xff] (!%p152_p3)  ;;  %v1008_v23 = vmov (!%p152_p3), 0   ;;  %vm676_vm1 = vcmask (!%p152_p3), 64512  }
   0x8   : > { %871 = vmatprep.mubr.msk.f32.mxu0 (!%p152_p3), %vm209_vm0, %v783_v1  ;;  %v195_v21 = vld [vmem:[%s1143_s1] sm:$0xff] (!%p152_p3)  ;;  %982 = vset.pattern.permute.xlu1 (!%p152_p3), %v1008_v23  ;;  %v196_v25 = vld [vmem:[%s1143_s1 + $0x8] sm:$0xff] (!%p152_p3)  ;;  %v650_v26 = vld [vmem:[%s1144_s2 + $0x10] sm:$0xff] (!%p152_p3) }
   0x9   : > { %981 = vset.pattern.permute.xlu0 (!%p152_p3), %v1008_v23  ;;  %v648_v24 = vld [vmem:[%s1144_s2] sm:$0xff] (!%p152_p3)  ;;  %v197_v27 = vld [vmem:[%s1143_s1 + $0x10] sm:$0xff] (!%p152_p3)  ;;  %v651_v28 = vld [vmem:[%s1144_s2 + $0x18] sm:$0xff] (!%p152_p3) }
   0xa   : > { %v198_v29 = vld [vmem:[%s1143_s1 + $0x18] sm:$0xff] (!%p152_p3)  ;;  %v784_v45 = vld [vmem:[%s1143_s1 + $0x48] sm:$0xff] (!%p152_p3)  ;;  %v785_v47 = vld [vmem:[%s1143_s1 + $0x50] sm:$0xff] (!%p152_p3) }
   0xb   : > { %v786_v48 = vld [vmem:[%s1143_s1 + $0x58] sm:$0xff] (!%p152_p3)  ;;  %v791_v49 = vld [vmem:[%s1143_s1 + $0x60] sm:$0xff] (!%p152_p3)  ;;  %v792_v50 = vld [vmem:[%s1143_s1 + $0x68] sm:$0xff] (!%p152_p3) }
   0xc   : > { %v793_v51 = vld [vmem:[%s1143_s1 + $0x70] sm:$0xff] (!%p152_p3)  ;;  %v794_v52 = vld [vmem:[%s1143_s1 + $0x78] sm:$0xff] (!%p152_p3) }
   0xe   : > { %s1151_s12 = smov (!%p178_p4, %s997_s12), 1 }
   0xf   : > { %s801_s18 = sshll.u32 %s1151_s12, 6  ;;  %s802_s11 = sshll.u32 %s1151_s12, 5 }
  0x10   : > { %s182_s21 = scalar_lea.vmem %s1142_s0, %s801_s18  ;;  %s190_s18 = scalar_lea.vmem %s1145_s3, %s802_s11 }
  0x11   : > { %v191_v2 = vld [vmem:[%s182_s21] sm:$0xff]  ;;  %v192_v3 = vld [vmem:[%s182_s21 + $0x8] sm:$0xff]  ;;  %v193_v4 = vld [vmem:[%s182_s21 + $0x10] sm:$0xff] }
  0x12   : > { %v961_v5 = vpack.i.bf16 %v192_v3, %v191_v2  ;;  %v194_v6 = vld [vmem:[%s182_s21 + $0x18] sm:$0xff]  ;;  %v767_v7 = vld [vmem:[%s182_s21 + $0x20] sm:$0xff]  ;;  %v768_v8 = vld [vmem:[%s182_s21 + $0x28] sm:$0xff]  ;;  %v899_v16 = vpack.c.bf16 %v192_v3, %v191_v2 }
  0x13   : > { %v971_v9 = vpack.i.bf16 %v768_v8, %v767_v7  ;;  %v769_v10 = vld [vmem:[%s182_s21 + $0x30] sm:$0xff]  ;;  %v770_v11 = vld [vmem:[%s182_s21 + $0x38] sm:$0xff]  ;;  %v891_v12 = vpack.c.bf16 %v768_v8, %v767_v7  ;;  %v966_v13 = vpack.i.bf16 %v194_v6, %v193_v4  ;;  %v903_v19 = vpack.c.bf16 %v194_v6, %v193_v4 }
  0x14   : > { %962 = vrot.lane.b32.xlu0 %v961_v5, %s1007_s24  ;;  %v895_v14 = vpack.c.bf16 %v770_v11, %v769_v10  ;;  %v976_v15 = vpack.i.bf16 %v770_v11, %v769_v10 }
  0x15   : > { %972 = vrot.lane.b32.xlu1 %v971_v9, %s1007_s24  ;;  %892 = vmatprep.subr.bf16.mxu1 %v891_v12 }
  0x16   : > { %894 = vmatpush3.bf16.msra.mxu1 %v891_v12 }
  0x17   : > { %896 = vmatprep.subr.bf16.mxu1 %v895_v14 }
  0x18   : > { %967 = vrot.lane.b32.xlu0 %v966_v13, %s1007_s24 }
  0x19   : > { %977 = vrot.lane.b32.xlu1 %v976_v15, %s1007_s24 }
  0x1a   : > { %898 = vmatpush3.bf16.msra.mxu1 %v895_v14 }
  0x1b   : > { %900 = vmatprep.subr.bf16.mxu1 %v899_v16 }
  0x1c   : > { %654 = vperm.xlu0 %981, %v648_v24  }
  0x1d   : > { %844 = vmatmul.mubr.msk.f32.vlgmr.msra.gmra.mrb[0].mxu1 %vm209_vm0, %v772_v17  ;;  %659 = vperm.xlu1 %982, %v649_v22  }
  0x1e   : > { %902 = vmatpush3.bf16.msra.mxu1 %v899_v16  ;;  %846 = vmatprep.mubr.msk.f32.mxu1 %vm209_vm0, %v773_v18 }
  0x1f   : > { %904 = vmatprep.subr.bf16.mxu1 %v903_v19 }
  0x20   : > { %669 = vperm.xlu0 %981, %v651_v28  }
  0x21   : > { %847 = vmatmul.mubr.msk.f32.gmra.mrb[2].mxu1 %vm209_vm0, %v774_v20  ;;  %664 = vperm.xlu1 %982, %v650_v26  }
  0x22   : > { %906 = vmatpush3.bf16.msra.mxu1 %v903_v19  ;;  %857 = vmatprep.mubr.msk.f32.mxu1 %vm209_vm0, %v195_v21 }
  0x25   : > { %858 = vmatmul.mubr.msk.f32.vlgmr.msra.gmra.mrb[0].mxu1 %vm209_vm0, %v196_v25 }
  0x26   : > { %860 = vmatprep.mubr.msk.f32.mxu1 %vm209_vm0, %v197_v27 }
  0x29   : > { %861 = vmatmul.mubr.msk.f32.gmra.mrb[2].mxu1 %vm209_vm0, %v198_v29 }
  0x86   : > { %v963_v30 = vpop.permute.xlu0 %962 }
  0x87   : > { %v965_v31 = vunpack.i.h.bf16 %v963_v30  ;;  %v964_v32 = vunpack.i.l.bf16 %v963_v30  ;;  %v973_v33 = vpop.permute.xlu1 %972 }
  0x88   : > { %v975_v35 = vunpack.i.h.bf16 %v973_v33  ;;  %v974_v36 = vunpack.i.l.bf16 %v973_v33 }
  0x89   : > { %v907_v34 = vpack.c.bf16 %v965_v31, %v964_v32 }
  0x8a   : > { %v968_v37 = vpop.permute.xlu0 %967  ;;  %v915_v42 = vpack.c.bf16 %v975_v35, %v974_v36 }
  0x8b   : > { %v970_v38 = vunpack.i.h.bf16 %v968_v37  ;;  %v969_v39 = vunpack.i.l.bf16 %v968_v37  ;;  %908 = vmatprep.subr.bf16.mxu0 %v907_v34  ;;  %v978_v40 = vpop.permute.xlu1 %977 }
  0x8c   : > { %910 = vmatpush3.bf16.msra.mxu0 %v907_v34  ;;  %v980_v43 = vunpack.i.h.bf16 %v978_v40  ;;  %v979_v44 = vunpack.i.l.bf16 %v978_v40 }
  0x8d   : > { %v911_v41 = vpack.c.bf16 %v970_v38, %v969_v39 }
  0x8e   : > { %v919_v46 = vpack.c.bf16 %v980_v43, %v979_v44 }
  0x8f   : > { %912 = vmatprep.subr.bf16.mxu0 %v911_v41 }
  0x90   : > { %914 = vmatpush3.bf16.msra.mxu0 %v911_v41 }
  0x91   : > { %916 = vmatprep.subr.bf16.mxu0 %v915_v42 }
  0x93   : > { %872 = vmatmul.mubr.msk.f32.vlgmr.msra.gmra.mrb[0].mxu0 %vm209_vm0, %v784_v45 }
  0x94   : > { %918 = vmatpush3.bf16.msra.mxu0 %v915_v42  ;;  %874 = vmatprep.mubr.msk.f32.mxu0 %vm209_vm0, %v785_v47 }
  0x95   : > { %920 = vmatprep.subr.bf16.mxu0 %v919_v46 }
  0x97   : > { %875 = vmatmul.mubr.msk.f32.gmra.mrb[2].mxu0 %vm209_vm0, %v786_v48 }
  0x98   : > { %922 = vmatpush3.bf16.msra.mxu0 %v919_v46  ;;  %885 = vmatprep.mubr.msk.f32.mxu0 %vm209_vm0, %v791_v49 }
  0x9b   : > { %886 = vmatmul.mubr.msk.f32.vlgmr.msra.gmra.mrb[0].mxu0 %vm209_vm0, %v792_v50  ;;  %v655_v57 = vpop.permute.xlu0 %654 }
  0x9c   : > { %888 = vmatprep.mubr.msk.f32.mxu0 %vm209_vm0, %v793_v51  ;;  %v660_v59 = vpop.permute.xlu1 %659 }
  0x9f   : > { %889 = vmatmul.mubr.msk.f32.gmra.mrb[2].mxu0 %vm209_vm0, %v794_v52  ;;  %v670_v4 = vpop.permute.xlu0 %669 }
  0xa0   : > { %v665_v6 = vpop.permute.xlu1 %664 }
  0xf8   : > { %v859_v53 = vpop.f32.mrb[0].mxu1 }
  0xf9   : > { %v385_v54 = vpop.f32.mrb[1].mxu1 }
  0xfc   : > { %v862_v55 = vpop.f32.mrb[2].mxu1 }
  0xfd   : > { %v395_v56 = vpop.f32.mrb[3].mxu1 }
 0x16e   : > { %v887_v58 = vpop.f32.mrb[0].mxu0 }
 0x16f   : > { %v923_v60 = vadd.f32 %v887_v58, %v859_v53  ;;  %v625_v61 = vpop.f32.mrb[1].mxu0 }
 0x170   : > { %v924_v62 = vadd.f32 %v625_v61, %v385_v54 }
 0x171   : > { %v673_v63 = vadd.f32 %v923_v60, %v660_v59 }
 0x172   : > { %v672_v0 = vadd.f32 %v924_v62, %v655_v57  ;;  %v890_v1 = vpop.f32.mrb[2].mxu0 }
 0x173   : > { %678 = vst.msk [vmem:[%s190_s18 + $0x8] sm:$0xff] %vm676_vm1, %v673_v63  ;;  %v925_v2 = vadd.f32 %v890_v1, %v862_v55  ;;  %v635_v3 = vpop.f32.mrb[3].mxu0 }
 0x174   : > { %677 = vst.msk [vmem:[%s190_s18] sm:$0xff] %vm676_vm1, %v672_v0  ;;  %v926_v5 = vadd.f32 %v635_v3, %v395_v56 }
 0x175   : > { %v675_v7 = vadd.f32 %v925_v2, %v670_v4 }
 0x176   : > { %v674_v8 = vadd.f32 %v926_v5, %v665_v6 }
 0x177   : > { %680 = vst.msk [vmem:[%s190_s18 + $0x18] sm:$0xff] %vm676_vm1, %v675_v7 }
 0x178   : > { %679 = vst.msk [vmem:[%s190_s18 + $0x10] sm:$0xff] %vm676_vm1, %v674_v8 }
 0x179 PF: > { %s13_s14 = sadd.s32 1, %s1005_s14   ;;  %s1146_s12 = smov %s1001_s13 }
 0x17a   : > { %p10_p5 = scmp.ge.s32.totalorder %s13_s14, 4   ;;  %s1147_s13 = smov %s1149_s15 }
 0x17c   :  { %12 = sbr.rel (!%p10_p5) target bundleno = 2 (0x2), region = 66 }

// kernel: motion_encoder_forward.8
= control target key start
LH: loop header
LB: loop body
LE: loop exit
PB: predicated region body
PF: predicated region fallthrough
CT: control target
= control target key end

     0   :  { %s1121_s18 = smov 0   ;;  %s1123_s19 = smov 0   ;;  %s1255_s0 = inlined_call_operand.vmem [shape: f32[2,32,10], index: 0, kind: input, shape index: {}]   ;;  %s1256_s1 = inlined_call_operand.vmem [shape: f32[3,32,32], index: 1, kind: input, shape index: {}]   ;;  %s1257_s2 = inlined_call_operand.vmem [shape: f32[32,1], index: 2, kind: input, shape index: {}]   ;;  %s1258_s3 = inlined_call_operand.vmem [shape: f32[32,32], index: 3, kind: input, shape index: {}]   ;;  %s1259_s4 = inlined_call_operand.vmem [shape: f32[32,1], index: 4, kind: input, shape index: {}]   ;;  %s1260_s5 = inlined_call_operand.vmem [shape: f32[2,32,8], index: 5, kind: output, shape index: {}]  }
   0x1   :  { %s1125_s20 = smov 0  }
   0x2 LB: > { %s27_s21 = sadd.s32 1, %s1082_s19  ;;  %p854_p0 = scmp.ge.s32.totalorder %s1086_s20, 1  ;;  %s1086_s20 = sphi %s1125_s20, %s15_s20   ;;  %s1082_s19 = sphi %s1123_s19, %s1262_s19   ;;  %s1078_s18 = sphi %s1121_s18, %s1261_s18  }
   0x3   : > { %p29_p1 = scmp.ge.s32.totalorder %s27_s21, 2  ;;  %p201_p2 = scmp.lt.s32.totalorder %s1086_s20, 3 }
   0x5   : > { %s1264_s21 = smov (%p29_p1, %s27_s21), 0  ;;  %p202_p3 = pnand %p854_p0, %p201_p2 }
   0x6   : > { %p232_p4 = scmp.lt.s32.totalorder (!%p202_p3), %s1078_s18, 1  ;;  %v253_v0 = vld [vmem:[%s1256_s1] sm:$0xff] (!%p202_p3)  ;;  %vm278_vm0 = vcmask (!%p202_p3), 261120   ;;  %s1088_s28 = smov (!%p202_p3), 127   ;;  %v254_v14 = vld [vmem:[%s1256_s1 + $0x8] sm:$0xff] (!%p202_p3)  ;;  %v255_v15 = vld [vmem:[%s1256_s1 + $0x10] sm:$0xff] (!%p202_p3) }
   0x7   : > { %205 = sbr.rel (%p202_p3) target bundleno = 604 (0x25c), region = 40  ;;  %941 = vmatprep.mubr.msk.f32.mxu0 (!%p202_p3), %vm278_vm0, %v253_v0  ;;  %v859_v13 = vld [vmem:[%s1256_s1 + $0x20] sm:$0xff] (!%p202_p3)  ;;  %s1089_s6 = smov (!%p202_p3), 126   ;;  %v592_v16 = vld [vmem:[%s1257_s2 + $0x8] sm:$0xff] (!%p202_p3)  ;;  %v1090_v18 = vmov (!%p202_p3), 0   ;;  %v256_v19 = vld [vmem:[%s1256_s1 + $0x18] sm:$0xff] (!%p202_p3) }
   0x8   : > { %927 = vmatprep.mubr.msk.f32.mxu1 (!%p202_p3), %vm278_vm0, %v859_v13  ;;  %v591_v17 = vld [vmem:[%s1257_s2] sm:$0xff] (!%p202_p3)  ;;  %1063 = vset.pattern.permute.xlu1 (!%p202_p3), %v1090_v18  ;;  %v593_v21 = vld [vmem:[%s1257_s2 + $0x10] sm:$0xff] (!%p202_p3)  ;;  %v594_v22 = vld [vmem:[%s1257_s2 + $0x18] sm:$0xff] (!%p202_p3)  ;;  %vm768_vm1 = vcmask (!%p202_p3), 64512  }
   0x9   : > { %1062 = vset.pattern.permute.xlu0 (!%p202_p3), %v1090_v18  ;;  %v871_v20 = vld [vmem:[%s1256_s1 + $0x40] sm:$0xff] (!%p202_p3)  ;;  %v628_v24 = vld [vmem:[%s1259_s4 + $0x8] sm:$0xff] (!%p202_p3)  ;;  %v629_v25 = vld [vmem:[%s1259_s4 + $0x10] sm:$0xff] (!%p202_p3) }
   0xa   : > { %v627_v23 = vld [vmem:[%s1259_s4] sm:$0xff] (!%p202_p3)  ;;  %v630_v26 = vld [vmem:[%s1259_s4 + $0x18] sm:$0xff] (!%p202_p3)  ;;  %v860_v43 = vld [vmem:[%s1256_s1 + $0x28] sm:$0xff] (!%p202_p3) }
   0xb   : > { %v861_v44 = vld [vmem:[%s1256_s1 + $0x30] sm:$0xff] (!%p202_p3)  ;;  %v872_v45 = vld [vmem:[%s1256_s1 + $0x48] sm:$0xff] (!%p202_p3)  ;;  %v862_v46 = vld [vmem:[%s1256_s1 + $0x38] sm:$0xff] (!%p202_p3) }
   0xc   : > { %v873_v47 = vld [vmem:[%s1256_s1 + $0x50] sm:$0xff] (!%p202_p3)  ;;  %v874_v48 = vld [vmem:[%s1256_s1 + $0x58] sm:$0xff] (!%p202_p3)  ;;  %v623_v49 = vld [vmem:[%s1258_s3] sm:$0xff] (!%p202_p3) }
   0xd   : > { %v625_v13 = vld [vmem:[%s1258_s3 + $0x10] sm:$0xff] (!%p202_p3) }
   0xe   : > { %s1266_s18 = smov (!%p232_p4, %s1078_s18), 1 }
   0xf   : > { %s885_s22 = sshll.u32 %s1266_s18, 5 }
  0x10   : > { %s236_s27 = scalar_lea.vmem %s1255_s0, %s885_s22  ;;  %s244_s13 = scalar_lea.vmem %s1260_s5, %s885_s22 }
  0x11   : > { %v245_v1 = vld [vmem:[%s236_s27] sm:$0xff]  ;;  %v246_v2 = vld [vmem:[%s236_s27 + $0x8] sm:$0xff]  ;;  %v247_v3 = vld [vmem:[%s236_s27 + $0x10] sm:$0xff] }
  0x12   : > { %v249_v4 = vmax.f32 %v245_v1, 0.0  ;;  %v250_v5 = vmax.f32 %v246_v2, 0.0  ;;  %v248_v6 = vld [vmem:[%s236_s27 + $0x18] sm:$0xff]  ;;  %v251_v7 = vmax.f32 %v247_v3, 0.0 }
  0x13   : > { %v252_v8 = vmax.f32 %v248_v6, 0.0 }
  0x14   : > { %v1042_v9 = vpack.i.bf16 %v250_v5, %v249_v4  ;;  %v983_v10 = vpack.c.bf16 %v250_v5, %v249_v4 }
  0x15   : > { %v1052_v11 = vpack.i.bf16 %v252_v8, %v251_v7  ;;  %v987_v12 = vpack.c.bf16 %v252_v8, %v251_v7 }
  0x16   : > { %1043 = vrot.lane.b32.xlu0 %v1042_v9, %s1088_s28  ;;  %984 = vmatprep.subr.bf16.mxu0 %v983_v10 }
  0x17   : > { %1053 = vrot.lane.b32.xlu1 %v1052_v11, %s1088_s28  ;;  %986 = vmatpush3.bf16.msra.mxu0 %v983_v10 }
  0x18   : > { %988 = vmatprep.subr.bf16.mxu0 %v987_v12 }
  0x1a   : > { %1048 = vrot.lane.b32.xlu0 %v1042_v9, %s1089_s6 }
  0x1b   : > { %1058 = vrot.lane.b32.xlu1 %v1052_v11, %s1089_s6  ;;  %990 = vmatpush3.bf16.msra.mxu0 %v987_v12  ;;  %v624_v12 = vld [vmem:[%s1258_s3 + $0x8] sm:$0xff] }
  0x1e   : > { %942 = vmatmul.mubr.msk.f32.vlgmr.msra.gmra.mrb[0].mxu0 %vm278_vm0, %v254_v14  ;;  %597 = vperm.xlu0 %1062, %v591_v17   ;;  %v626_v14 = vld [vmem:[%s1258_s3 + $0x18] sm:$0xff] }
  0x1f   : > { %944 = vmatprep.mubr.msk.f32.mxu0 %vm278_vm0, %v255_v15  ;;  %602 = vperm.xlu1 %1063, %v592_v16  }
  0x22   : > { %945 = vmatmul.mubr.msk.f32.gmra.mrb[2].mxu0 %vm278_vm0, %v256_v19  ;;  %612 = vperm.xlu0 %1062, %v594_v22  }
  0x23   : > { %955 = vmatprep.mubr.msk.f32.mxu0 %vm278_vm0, %v871_v20  ;;  %607 = vperm.xlu1 %1063, %v593_v21  }
  0x26   : > { %638 = vperm.xlu0 %1062, %v628_v24  }
  0x27   : > { %633 = vperm.xlu1 %1063, %v627_v23  }
  0x2a   : > { %648 = vperm.xlu0 %1062, %v630_v26  }
  0x2b   : > { %643 = vperm.xlu1 %1063, %v629_v25  }
  0x2e   : > { %754 = vrot.lane.b32.xlu0 %v246_v2, %s1088_s28 }
  0x2f   : > { %752 = vrot.lane.b32.xlu1 %v245_v1, %s1088_s28 }
  0x32   : > { %758 = vrot.lane.b32.xlu0 %v248_v6, %s1088_s28 }
  0x33   : > { %756 = vrot.lane.b32.xlu1 %v247_v3, %s1088_s28 }
  0x88   : > { %v1044_v27 = vpop.permute.xlu0 %1043 }
  0x89   : > { %v1046_v28 = vunpack.i.h.bf16 %v1044_v27  ;;  %v1045_v29 = vunpack.i.l.bf16 %v1044_v27  ;;  %v1054_v30 = vpop.permute.xlu1 %1053 }
  0x8a   : > { %v1056_v31 = vunpack.i.h.bf16 %v1054_v30  ;;  %v1055_v32 = vunpack.i.l.bf16 %v1054_v30 }
  0x8b   : > { %v975_v33 = vpack.c.bf16 %v1046_v28, %v1045_v29 }
  0x8c   : > { %v979_v34 = vpack.c.bf16 %v1056_v31, %v1055_v32  ;;  %v1049_v35 = vpop.permute.xlu0 %1048 }
  0x8d   : > { %v1051_v36 = vunpack.i.h.bf16 %v1049_v35  ;;  %v1050_v37 = vunpack.i.l.bf16 %v1049_v35  ;;  %976 = vmatprep.subr.bf16.mxu1 %v975_v33  ;;  %v1059_v38 = vpop.permute.xlu1 %1058 }
  0x8e   : > { %978 = vmatpush3.bf16.msra.mxu1 %v975_v33  ;;  %v1061_v39 = vunpack.i.h.bf16 %v1059_v38  ;;  %v1060_v40 = vunpack.i.l.bf16 %v1059_v38 }
  0x8f   : > { %v991_v41 = vpack.c.bf16 %v1051_v36, %v1050_v37  ;;  %980 = vmatprep.subr.bf16.mxu1 %v979_v34 }
  0x90   : > { %v995_v42 = vpack.c.bf16 %v1061_v39, %v1060_v40 }
  0x91   : > { %992 = vmatprep.subr.bf16.mxu0 %v991_v41 }
  0x92   : > { %982 = vmatpush3.bf16.msra.mxu1 %v979_v34  ;;  %994 = vmatpush3.bf16.msra.mxu0 %v991_v41 }
  0x93   : > { %996 = vmatprep.subr.bf16.mxu0 %v995_v42 }
  0x95   : > { %928 = vmatmul.mubr.msk.f32.vlgmr.msra.gmra.mrb[0].mxu1 %vm278_vm0, %v860_v43 }
  0x96   : > { %998 = vmatpush3.bf16.msra.mxu0 %v995_v42  ;;  %930 = vmatprep.mubr.msk.f32.mxu1 %vm278_vm0, %v861_v44 }
  0x99   : > { %956 = vmatmul.mubr.msk.f32.vlgmr.msra.gmra.mrb[0].mxu0 %vm278_vm0, %v872_v45  ;;  %931 = vmatmul.mubr.msk.f32.gmra.mrb[2].mxu1 %vm278_vm0, %v862_v46 }
  0x9a   : > { %958 = vmatprep.mubr.msk.f32.mxu0 %vm278_vm0, %v873_v47  ;;  %969 = vmatprep.mubr.msk.f32.mxu1 %vm278_vm0, %v623_v49 }
  0x9d   : > { %959 = vmatmul.mubr.msk.f32.gmra.mrb[2].mxu0 %vm278_vm0, %v874_v48  ;;  %v598_v53 = vpop.permute.xlu0 %597 }
  0x9e   : > { %v603_v52 = vpop.permute.xlu1 %602 }
  0xa1   : > { %v613_v2 = vpop.permute.xlu0 %612 }
  0xa2   : > { %v608_v5 = vpop.permute.xlu1 %607 }
  0xa5   : > { %v639_v15 = vpop.permute.xlu0 %638 }
  0xa6   : > { %v634_v16 = vpop.permute.xlu1 %633 }
  0xa9   : > { %v649_v17 = vpop.permute.xlu0 %648 }
  0xaa   : > { %v644_v18 = vpop.permute.xlu1 %643 }
  0xad   : > { %v755_v19 = vpop.permute.xlu0 %754 }
  0xae   : > { %v753_v20 = vpop.permute.xlu1 %752 }
  0xb1   : > { %v759_v28 = vpop.permute.xlu0 %758 }
  0xb2   : > { %v757_v31 = vpop.permute.xlu1 %756 }
 0x168   : > { %v929_v50 = vpop.f32.mrb[0].mxu1 }
 0x169   : > { %v357_v51 = vpop.f32.mrb[1].mxu1 }
 0x16c   : > { %v957_v54 = vpop.f32.mrb[0].mxu0  ;;  %v932_v55 = vpop.f32.mrb[2].mxu1 }
 0x16d   : > { %v1007_v56 = vadd.f32 %v957_v54, %v929_v50  ;;  %v568_v57 = vpop.f32.mrb[1].mxu0  ;;  %v367_v58 = vpop.f32.mrb[3].mxu1 }
 0x16e   : > { %v1008_v59 = vadd.f32 %v568_v57, %v357_v51 }
 0x16f   : > { %v616_v60 = vadd.f32 %v1007_v56, %v603_v52 }
 0x170   : > { %v615_v61 = vadd.f32 %v1008_v59, %v598_v53  ;;  %v960_v62 = vpop.f32.mrb[2].mxu0 }
 0x171   : > { %v620_v63 = vmax.f32 %v616_v60, 0.0  ;;  %v1009_v0 = vadd.f32 %v960_v62, %v932_v55  ;;  %v578_v1 = vpop.f32.mrb[3].mxu0 }
 0x172   : > { %v619_v3 = vmax.f32 %v615_v61, 0.0  ;;  %v1010_v4 = vadd.f32 %v578_v1, %v367_v58 }
 0x173   : > { %v618_v6 = vadd.f32 %v1009_v0, %v613_v2 }
 0x174   : > { %v617_v7 = vadd.f32 %v1010_v4, %v608_v5  ;;  %v999_v8 = vpack.c.bf16 %v620_v63, %v619_v3 }
 0x175   : > { %v622_v9 = vmax.f32 %v618_v6, 0.0 }
 0x176   : > { %v621_v10 = vmax.f32 %v617_v7, 0.0  ;;  %1000 = vmatprep.subr.bf16.mxu1 %v999_v8 }
 0x177   : > { %1002 = vmatpush3.bf16.msra.mxu1 %v999_v8 }
 0x178   : > { %v1003_v11 = vpack.c.bf16 %v622_v9, %v621_v10 }
 0x17a   : > { %1004 = vmatprep.subr.bf16.mxu1 %v1003_v11 }
 0x17b   : > { %1006 = vmatpush3.bf16.msra.mxu1 %v1003_v11 }
 0x17e   : > { %970 = vmatmul.mubr.msk.f32.vlgmr.msra.gmra.mrb[4].mxu1 %vm278_vm0, %v624_v12 }
 0x17f   : > { %972 = vmatprep.mubr.msk.f32.mxu1 %vm278_vm0, %v625_v13 }
 0x182   : > { %973 = vmatmul.mubr.msk.f32.gmra.mrb[6].mxu1 %vm278_vm0, %v626_v14 }
 0x251   : > { %v971_v21 = vpop.f32.mrb[4].mxu1 }
 0x252   : > { %v735_v22 = vadd.f32 %v971_v21, %v639_v15  ;;  %v729_v23 = vpop.f32.mrb[5].mxu1 }
 0x253   : > { %v730_v24 = vadd.f32 %v729_v23, %v634_v16 }
 0x254   : > { %v765_v25 = vadd.f32 %v755_v19, %v735_v22 }
 0x255   : > { %v764_v26 = vadd.f32 %v753_v20, %v730_v24  ;;  %v974_v27 = vpop.f32.mrb[6].mxu1 }
 0x256   : > { %770 = vst.msk [vmem:[%s244_s13 + $0x8] sm:$0xff] %vm768_vm1, %v765_v25  ;;  %v745_v29 = vadd.f32 %v974_v27, %v649_v17  ;;  %v739_v30 = vpop.f32.mrb[7].mxu1 }
 0x257   : > { %769 = vst.msk [vmem:[%s244_s13] sm:$0xff] %vm768_vm1, %v764_v26  ;;  %v740_v32 = vadd.f32 %v739_v30, %v644_v18 }
 0x258   : > { %v767_v33 = vadd.f32 %v759_v28, %v745_v29 }
 0x259   : > { %v766_v34 = vadd.f32 %v757_v31, %v740_v32 }
 0x25a   : > { %772 = vst.msk [vmem:[%s244_s13 + $0x18] sm:$0xff] %vm768_vm1, %v767_v33 }
 0x25b   : > { %771 = vst.msk [vmem:[%s244_s13 + $0x10] sm:$0xff] %vm768_vm1, %v766_v34 }
 0x25c PF: > { %s15_s20 = sadd.s32 1, %s1086_s20   ;;  %s1261_s18 = smov %s1082_s19 }
 0x25d   : > { %p12_p5 = scmp.ge.s32.totalorder %s15_s20, 4   ;;  %s1262_s19 = smov %s1264_s21 }
 0x25f   :  { %14 = sbr.rel (!%p12_p5) target bundleno = 2 (0x2), region = 72 }

// kernel: motion_encoder_forward.7
= control target key start
LH: loop header
LB: loop body
LE: loop exit
PB: predicated region body
PF: predicated region fallthrough
CT: control target
= control target key end

     0   :  { %s1121_s18 = smov 0   ;;  %s1123_s19 = smov 0   ;;  %s1255_s0 = inlined_call_operand.vmem [shape: f32[2,32,12], index: 0, kind: input, shape index: {}]   ;;  %s1256_s1 = inlined_call_operand.vmem [shape: f32[3,32,32], index: 1, kind: input, shape index: {}]   ;;  %s1257_s2 = inlined_call_operand.vmem [shape: f32[32,1], index: 2, kind: input, shape index: {}]   ;;  %s1258_s3 = inlined_call_operand.vmem [shape: f32[32,32], index: 3, kind: input, shape index: {}]   ;;  %s1259_s4 = inlined_call_operand.vmem [shape: f32[32,1], index: 4, kind: input, shape index: {}]   ;;  %s1260_s5 = inlined_call_operand.vmem [shape: f32[2,32,8], index: 5, kind: output, shape index: {}]  }
   0x1   :  { %s1125_s20 = smov 0  }
   0x2 LB: > { %s27_s21 = sadd.s32 1, %s1082_s19  ;;  %p854_p0 = scmp.ge.s32.totalorder %s1086_s20, 1  ;;  %s1086_s20 = sphi %s1125_s20, %s15_s20   ;;  %s1082_s19 = sphi %s1123_s19, %s1262_s19   ;;  %s1078_s18 = sphi %s1121_s18, %s1261_s18  }
   0x3   : > { %p29_p1 = scmp.ge.s32.totalorder %s27_s21, 2  ;;  %p201_p2 = scmp.lt.s32.totalorder %s1086_s20, 3 }
   0x5   : > { %s1264_s21 = smov (%p29_p1, %s27_s21), 0  ;;  %p202_p3 = pnand %p854_p0, %p201_p2 }
   0x6   : > { %p232_p4 = scmp.lt.s32.totalorder (!%p202_p3), %s1078_s18, 1  ;;  %v253_v0 = vld [vmem:[%s1256_s1] sm:$0xff] (!%p202_p3)  ;;  %vm278_vm0 = vcmask (!%p202_p3), 261120   ;;  %s1088_s28 = smov (!%p202_p3), 126   ;;  %v254_v14 = vld [vmem:[%s1256_s1 + $0x8] sm:$0xff] (!%p202_p3)  ;;  %v255_v15 = vld [vmem:[%s1256_s1 + $0x10] sm:$0xff] (!%p202_p3) }
   0x7   : > { %205 = sbr.rel (%p202_p3) target bundleno = 604 (0x25c), region = 40  ;;  %941 = vmatprep.mubr.msk.f32.mxu0 (!%p202_p3), %vm278_vm0, %v253_v0  ;;  %v859_v13 = vld [vmem:[%s1256_s1 + $0x20] sm:$0xff] (!%p202_p3)  ;;  %s1089_s6 = smov (!%p202_p3), 124   ;;  %v592_v16 = vld [vmem:[%s1257_s2 + $0x8] sm:$0xff] (!%p202_p3)  ;;  %v1090_v18 = vmov (!%p202_p3), 0   ;;  %v256_v19 = vld [vmem:[%s1256_s1 + $0x18] sm:$0xff] (!%p202_p3) }
   0x8   : > { %927 = vmatprep.mubr.msk.f32.mxu1 (!%p202_p3), %vm278_vm0, %v859_v13  ;;  %v591_v17 = vld [vmem:[%s1257_s2] sm:$0xff] (!%p202_p3)  ;;  %1063 = vset.pattern.permute.xlu1 (!%p202_p3), %v1090_v18  ;;  %v593_v21 = vld [vmem:[%s1257_s2 + $0x10] sm:$0xff] (!%p202_p3)  ;;  %v594_v22 = vld [vmem:[%s1257_s2 + $0x18] sm:$0xff] (!%p202_p3)  ;;  %vm768_vm1 = vcmask (!%p202_p3), 64512  }
   0x9   : > { %1062 = vset.pattern.permute.xlu0 (!%p202_p3), %v1090_v18  ;;  %v871_v20 = vld [vmem:[%s1256_s1 + $0x40] sm:$0xff] (!%p202_p3)  ;;  %v628_v24 = vld [vmem:[%s1259_s4 + $0x8] sm:$0xff] (!%p202_p3)  ;;  %v629_v25 = vld [vmem:[%s1259_s4 + $0x10] sm:$0xff] (!%p202_p3) }
   0xa   : > { %v627_v23 = vld [vmem:[%s1259_s4] sm:$0xff] (!%p202_p3)  ;;  %v630_v26 = vld [vmem:[%s1259_s4 + $0x18] sm:$0xff] (!%p202_p3)  ;;  %v860_v43 = vld [vmem:[%s1256_s1 + $0x28] sm:$0xff] (!%p202_p3) }
   0xb   : > { %v861_v44 = vld [vmem:[%s1256_s1 + $0x30] sm:$0xff] (!%p202_p3)  ;;  %v872_v45 = vld [vmem:[%s1256_s1 + $0x48] sm:$0xff] (!%p202_p3)  ;;  %v862_v46 = vld [vmem:[%s1256_s1 + $0x38] sm:$0xff] (!%p202_p3) }
   0xc   : > { %v873_v47 = vld [vmem:[%s1256_s1 + $0x50] sm:$0xff] (!%p202_p3)  ;;  %v874_v48 = vld [vmem:[%s1256_s1 + $0x58] sm:$0xff] (!%p202_p3)  ;;  %v623_v49 = vld [vmem:[%s1258_s3] sm:$0xff] (!%p202_p3) }
   0xd   : > { %v625_v13 = vld [vmem:[%s1258_s3 + $0x10] sm:$0xff] (!%p202_p3) }
   0xe   : > { %s1266_s18 = smov (!%p232_p4, %s1078_s18), 1 }
   0xf   : > { %s885_s22 = sshll.u32 %s1266_s18, 5 }
  0x10   : > { %s236_s27 = scalar_lea.vmem %s1255_s0, %s885_s22  ;;  %s244_s13 = scalar_lea.vmem %s1260_s5, %s885_s22 }
  0x11   : > { %v245_v1 = vld [vmem:[%s236_s27] sm:$0xff]  ;;  %v246_v2 = vld [vmem:[%s236_s27 + $0x8] sm:$0xff]  ;;  %v247_v3 = vld [vmem:[%s236_s27 + $0x10] sm:$0xff] }
  0x12   : > { %v249_v4 = vmax.f32 %v245_v1, 0.0  ;;  %v250_v5 = vmax.f32 %v246_v2, 0.0  ;;  %v248_v6 = vld [vmem:[%s236_s27 + $0x18] sm:$0xff]  ;;  %v251_v7 = vmax.f32 %v247_v3, 0.0 }
  0x13   : > { %v252_v8 = vmax.f32 %v248_v6, 0.0 }
  0x14   : > { %v1042_v9 = vpack.i.bf16 %v250_v5, %v249_v4  ;;  %v983_v10 = vpack.c.bf16 %v250_v5, %v249_v4 }
  0x15   : > { %v1052_v11 = vpack.i.bf16 %v252_v8, %v251_v7  ;;  %v987_v12 = vpack.c.bf16 %v252_v8, %v251_v7 }
  0x16   : > { %1043 = vrot.lane.b32.xlu0 %v1042_v9, %s1088_s28  ;;  %984 = vmatprep.subr.bf16.mxu0 %v983_v10 }
  0x17   : > { %1053 = vrot.lane.b32.xlu1 %v1052_v11, %s1088_s28  ;;  %986 = vmatpush3.bf16.msra.mxu0 %v983_v10 }
  0x18   : > { %988 = vmatprep.subr.bf16.mxu0 %v987_v12 }
  0x1a   : > { %1048 = vrot.lane.b32.xlu0 %v1042_v9, %s1089_s6 }
  0x1b   : > { %1058 = vrot.lane.b32.xlu1 %v1052_v11, %s1089_s6  ;;  %990 = vmatpush3.bf16.msra.mxu0 %v987_v12  ;;  %v624_v12 = vld [vmem:[%s1258_s3 + $0x8] sm:$0xff] }
  0x1e   : > { %942 = vmatmul.mubr.msk.f32.vlgmr.msra.gmra.mrb[0].mxu0 %vm278_vm0, %v254_v14  ;;  %597 = vperm.xlu0 %1062, %v591_v17   ;;  %v626_v14 = vld [vmem:[%s1258_s3 + $0x18] sm:$0xff] }
  0x1f   : > { %944 = vmatprep.mubr.msk.f32.mxu0 %vm278_vm0, %v255_v15  ;;  %602 = vperm.xlu1 %1063, %v592_v16  }
  0x22   : > { %945 = vmatmul.mubr.msk.f32.gmra.mrb[2].mxu0 %vm278_vm0, %v256_v19  ;;  %612 = vperm.xlu0 %1062, %v594_v22  }
  0x23   : > { %955 = vmatprep.mubr.msk.f32.mxu0 %vm278_vm0, %v871_v20  ;;  %607 = vperm.xlu1 %1063, %v593_v21  }
  0x26   : > { %638 = vperm.xlu0 %1062, %v628_v24  }
  0x27   : > { %633 = vperm.xlu1 %1063, %v627_v23  }
  0x2a   : > { %648 = vperm.xlu0 %1062, %v630_v26  }
  0x2b   : > { %643 = vperm.xlu1 %1063, %v629_v25  }
  0x2e   : > { %754 = vrot.lane.b32.xlu0 %v246_v2, %s1088_s28 }
  0x2f   : > { %752 = vrot.lane.b32.xlu1 %v245_v1, %s1088_s28 }
  0x32   : > { %758 = vrot.lane.b32.xlu0 %v248_v6, %s1088_s28 }
  0x33   : > { %756 = vrot.lane.b32.xlu1 %v247_v3, %s1088_s28 }
  0x88   : > { %v1044_v27 = vpop.permute.xlu0 %1043 }
  0x89   : > { %v1046_v28 = vunpack.i.h.bf16 %v1044_v27  ;;  %v1045_v29 = vunpack.i.l.bf16 %v1044_v27  ;;  %v1054_v30 = vpop.permute.xlu1 %1053 }
  0x8a   : > { %v1056_v31 = vunpack.i.h.bf16 %v1054_v30  ;;  %v1055_v32 = vunpack.i.l.bf16 %v1054_v30 }
  0x8b   : > { %v975_v33 = vpack.c.bf16 %v1046_v28, %v1045_v29 }
  0x8c   : > { %v979_v34 = vpack.c.bf16 %v1056_v31, %v1055_v32  ;;  %v1049_v35 = vpop.permute.xlu0 %1048 }
  0x8d   : > { %v1051_v36 = vunpack.i.h.bf16 %v1049_v35  ;;  %v1050_v37 = vunpack.i.l.bf16 %v1049_v35  ;;  %976 = vmatprep.subr.bf16.mxu1 %v975_v33  ;;  %v1059_v38 = vpop.permute.xlu1 %1058 }
  0x8e   : > { %978 = vmatpush3.bf16.msra.mxu1 %v975_v33  ;;  %v1061_v39 = vunpack.i.h.bf16 %v1059_v38  ;;  %v1060_v40 = vunpack.i.l.bf16 %v1059_v38 }
  0x8f   : > { %v991_v41 = vpack.c.bf16 %v1051_v36, %v1050_v37  ;;  %980 = vmatprep.subr.bf16.mxu1 %v979_v34 }
  0x90   : > { %v995_v42 = vpack.c.bf16 %v1061_v39, %v1060_v40 }
  0x91   : > { %992 = vmatprep.subr.bf16.mxu0 %v991_v41 }
  0x92   : > { %982 = vmatpush3.bf16.msra.mxu1 %v979_v34  ;;  %994 = vmatpush3.bf16.msra.mxu0 %v991_v41 }
  0x93   : > { %996 = vmatprep.subr.bf16.mxu0 %v995_v42 }
  0x95   : > { %928 = vmatmul.mubr.msk.f32.vlgmr.msra.gmra.mrb[0].mxu1 %vm278_vm0, %v860_v43 }
  0x96   : > { %998 = vmatpush3.bf16.msra.mxu0 %v995_v42  ;;  %930 = vmatprep.mubr.msk.f32.mxu1 %vm278_vm0, %v861_v44 }
  0x99   : > { %956 = vmatmul.mubr.msk.f32.vlgmr.msra.gmra.mrb[0].mxu0 %vm278_vm0, %v872_v45  ;;  %931 = vmatmul.mubr.msk.f32.gmra.mrb[2].mxu1 %vm278_vm0, %v862_v46 }
  0x9a   : > { %958 = vmatprep.mubr.msk.f32.mxu0 %vm278_vm0, %v873_v47  ;;  %969 = vmatprep.mubr.msk.f32.mxu1 %vm278_vm0, %v623_v49 }
  0x9d   : > { %959 = vmatmul.mubr.msk.f32.gmra.mrb[2].mxu0 %vm278_vm0, %v874_v48  ;;  %v598_v53 = vpop.permute.xlu0 %597 }
  0x9e   : > { %v603_v52 = vpop.permute.xlu1 %602 }
  0xa1   : > { %v613_v2 = vpop.permute.xlu0 %612 }
  0xa2   : > { %v608_v5 = vpop.permute.xlu1 %607 }
  0xa5   : > { %v639_v15 = vpop.permute.xlu0 %638 }
  0xa6   : > { %v634_v16 = vpop.permute.xlu1 %633 }
  0xa9   : > { %v649_v17 = vpop.permute.xlu0 %648 }
  0xaa   : > { %v644_v18 = vpop.permute.xlu1 %643 }
  0xad   : > { %v755_v19 = vpop.permute.xlu0 %754 }
  0xae   : > { %v753_v20 = vpop.permute.xlu1 %752 }
  0xb1   : > { %v759_v28 = vpop.permute.xlu0 %758 }
  0xb2   : > { %v757_v31 = vpop.permute.xlu1 %756 }
 0x168   : > { %v929_v50 = vpop.f32.mrb[0].mxu1 }
 0x169   : > { %v357_v51 = vpop.f32.mrb[1].mxu1 }
 0x16c   : > { %v957_v54 = vpop.f32.mrb[0].mxu0  ;;  %v932_v55 = vpop.f32.mrb[2].mxu1 }
 0x16d   : > { %v1007_v56 = vadd.f32 %v957_v54, %v929_v50  ;;  %v568_v57 = vpop.f32.mrb[1].mxu0  ;;  %v367_v58 = vpop.f32.mrb[3].mxu1 }
 0x16e   : > { %v1008_v59 = vadd.f32 %v568_v57, %v357_v51 }
 0x16f   : > { %v616_v60 = vadd.f32 %v1007_v56, %v603_v52 }
 0x170   : > { %v615_v61 = vadd.f32 %v1008_v59, %v598_v53  ;;  %v960_v62 = vpop.f32.mrb[2].mxu0 }
 0x171   : > { %v620_v63 = vmax.f32 %v616_v60, 0.0  ;;  %v1009_v0 = vadd.f32 %v960_v62, %v932_v55  ;;  %v578_v1 = vpop.f32.mrb[3].mxu0 }
 0x172   : > { %v619_v3 = vmax.f32 %v615_v61, 0.0  ;;  %v1010_v4 = vadd.f32 %v578_v1, %v367_v58 }
 0x173   : > { %v618_v6 = vadd.f32 %v1009_v0, %v613_v2 }
 0x174   : > { %v617_v7 = vadd.f32 %v1010_v4, %v608_v5  ;;  %v999_v8 = vpack.c.bf16 %v620_v63, %v619_v3 }
 0x175   : > { %v622_v9 = vmax.f32 %v618_v6, 0.0 }
 0x176   : > { %v621_v10 = vmax.f32 %v617_v7, 0.0  ;;  %1000 = vmatprep.subr.bf16.mxu1 %v999_v8 }
 0x177   : > { %1002 = vmatpush3.bf16.msra.mxu1 %v999_v8 }
 0x178   : > { %v1003_v11 = vpack.c.bf16 %v622_v9, %v621_v10 }
 0x17a   : > { %1004 = vmatprep.subr.bf16.mxu1 %v1003_v11 }
 0x17b   : > { %1006 = vmatpush3.bf16.msra.mxu1 %v1003_v11 }
 0x17e   : > { %970 = vmatmul.mubr.msk.f32.vlgmr.msra.gmra.mrb[4].mxu1 %vm278_vm0, %v624_v12 }
 0x17f   : > { %972 = vmatprep.mubr.msk.f32.mxu1 %vm278_vm0, %v625_v13 }
 0x182   : > { %973 = vmatmul.mubr.msk.f32.gmra.mrb[6].mxu1 %vm278_vm0, %v626_v14 }
 0x251   : > { %v971_v21 = vpop.f32.mrb[4].mxu1 }
 0x252   : > { %v735_v22 = vadd.f32 %v971_v21, %v639_v15  ;;  %v729_v23 = vpop.f32.mrb[5].mxu1 }
 0x253   : > { %v730_v24 = vadd.f32 %v729_v23, %v634_v16 }
 0x254   : > { %v765_v25 = vadd.f32 %v755_v19, %v735_v22 }
 0x255   : > { %v764_v26 = vadd.f32 %v753_v20, %v730_v24  ;;  %v974_v27 = vpop.f32.mrb[6].mxu1 }
 0x256   : > { %770 = vst.msk [vmem:[%s244_s13 + $0x8] sm:$0xff] %vm768_vm1, %v765_v25  ;;  %v745_v29 = vadd.f32 %v974_v27, %v649_v17  ;;  %v739_v30 = vpop.f32.mrb[7].mxu1 }
 0x257   : > { %769 = vst.msk [vmem:[%s244_s13] sm:$0xff] %vm768_vm1, %v764_v26  ;;  %v740_v32 = vadd.f32 %v739_v30, %v644_v18 }
 0x258   : > { %v767_v33 = vadd.f32 %v759_v28, %v745_v29 }
 0x259   : > { %v766_v34 = vadd.f32 %v757_v31, %v740_v32 }
 0x25a   : > { %772 = vst.msk [vmem:[%s244_s13 + $0x18] sm:$0xff] %vm768_vm1, %v767_v33 }
 0x25b   : > { %771 = vst.msk [vmem:[%s244_s13 + $0x10] sm:$0xff] %vm768_vm1, %v766_v34 }
 0x25c PF: > { %s15_s20 = sadd.s32 1, %s1086_s20   ;;  %s1261_s18 = smov %s1082_s19 }
 0x25d   : > { %p12_p5 = scmp.ge.s32.totalorder %s15_s20, 4   ;;  %s1262_s19 = smov %s1264_s21 }
 0x25f   :  { %14 = sbr.rel (!%p12_p5) target bundleno = 2 (0x2), region = 72 }

// kernel: motion_encoder_forward.9
= control target key start
LH: loop header
LB: loop body
LE: loop exit
PB: predicated region body
PF: predicated region fallthrough
CT: control target
= control target key end

     0   :  { %s769_s12 = smov 0   ;;  %s771_s13 = smov 0   ;;  %s836_s0 = inlined_call_operand.vmem [shape: f32[2,1,32,10], index: 0, kind: input, shape index: {}]   ;;  %s837_s1 = inlined_call_operand.vmem [shape: f32[3,16,32], index: 1, kind: input, shape index: {}]   ;;  %s838_s2 = inlined_call_operand.vmem [shape: f32[16,1], index: 2, kind: input, shape index: {}]   ;;  %s839_s3 = inlined_call_operand.vmem [shape: f32[2,16,8], index: 3, kind: output, shape index: {}]  }
   0x1   :  { %s773_s14 = smov 0  }
   0x2 LB: > { %s25_s15 = sadd.s32 1, %s740_s13  ;;  %p575_p0 = scmp.ge.s32.totalorder %s744_s14, 1  ;;  %s744_s14 = sphi %s773_s14, %s13_s14   ;;  %s740_s13 = sphi %s771_s13, %s841_s13   ;;  %s736_s12 = sphi %s769_s12, %s840_s12  }
   0x3   : > { %p27_p1 = scmp.ge.s32.totalorder %s25_s15, 2  ;;  %p151_p2 = scmp.lt.s32.totalorder %s744_s14, 3 }
   0x5   : > { %s843_s15 = smov (%p27_p1, %s25_s15), 0  ;;  %p152_p3 = pnand %p575_p0, %p151_p2 }
   0x6   : > { %p178_p4 = scmp.lt.s32.totalorder (!%p152_p3), %s736_s12, 1  ;;  %v195_v0 = vld [vmem:[%s837_s1] sm:$0xff] (!%p152_p3)  ;;  %vm216_vm0 = vcmask (!%p152_p3), 261120   ;;  %s746_s22 = smov (!%p152_p3), 127   ;;  %v580_v9 = vld [vmem:[%s837_s1 + $0x10] sm:$0xff] (!%p152_p3)  ;;  %v748_v10 = vmov (!%p152_p3), 0  }
   0x7   : > { %155 = sbr.rel (%p152_p3) target bundleno = 369 (0x171), region = 32  ;;  %631 = vmatprep.mubr.msk.f32.mxu0 (!%p152_p3), %vm216_vm0, %v195_v0  ;;  %620 = vmatprep.mubr.msk.f32.mxu1 (!%p152_p3), %vm216_vm0, %v580_v9  ;;  %s747_s25 = smov (!%p152_p3), 126   ;;  %v196_v11 = vld [vmem:[%s837_s1 + $0x8] sm:$0xff] (!%p152_p3)  ;;  %v477_v12 = vld [vmem:[%s838_s2] sm:$0xff] (!%p152_p3)  ;;  %v581_v31 = vld [vmem:[%s837_s1 + $0x18] sm:$0xff] (!%p152_p3)  ;;  %vm491_vm1 = vcmask (!%p152_p3), 64512  }
   0x8   : > { %721 = vset.pattern.permute.xlu1 (!%p152_p3), %v748_v10  ;;  %v586_v13 = vld [vmem:[%s837_s1 + $0x20] sm:$0xff] (!%p152_p3)  ;;  %720 = vset.pattern.permute.xlu0 (!%p152_p3), %v748_v10  ;;  %v478_v14 = vld [vmem:[%s838_s2 + $0x8] sm:$0xff] (!%p152_p3) }
   0x9   : > { %v587_v32 = vld [vmem:[%s837_s1 + $0x28] sm:$0xff] (!%p152_p3) }
   0xe   : > { %s845_s12 = smov (!%p178_p4, %s736_s12), 1 }
   0xf   : > { %s592_s18 = sshll.u32 %s845_s12, 5  ;;  %s593_s11 = sshll.u32 %s845_s12, 4 }
  0x10   : > { %s182_s21 = scalar_lea.vmem %s836_s0, %s592_s18  ;;  %s190_s18 = scalar_lea.vmem %s839_s3, %s593_s11 }
  0x11   : > { %v191_v1 = vld [vmem:[%s182_s21] sm:$0xff]  ;;  %v192_v2 = vld [vmem:[%s182_s21 + $0x8] sm:$0xff]  ;;  %v193_v3 = vld [vmem:[%s182_s21 + $0x10] sm:$0xff] }
  0x12   : > { %v700_v4 = vpack.i.bf16 %v192_v2, %v191_v1  ;;  %v194_v5 = vld [vmem:[%s182_s21 + $0x18] sm:$0xff]  ;;  %v653_v6 = vpack.c.bf16 %v192_v2, %v191_v1 }
  0x13   : > { %v710_v7 = vpack.i.bf16 %v194_v5, %v193_v3  ;;  %v657_v8 = vpack.c.bf16 %v194_v5, %v193_v3 }
  0x14   : > { %701 = vrot.lane.b32.xlu0 %v700_v4, %s746_s22  ;;  %654 = vmatprep.subr.bf16.mxu0 %v653_v6 }
  0x15   : > { %711 = vrot.lane.b32.xlu1 %v710_v7, %s746_s22  ;;  %656 = vmatpush3.bf16.msra.mxu0 %v653_v6 }
  0x16   : > { %658 = vmatprep.subr.bf16.mxu0 %v657_v8 }
  0x18   : > { %706 = vrot.lane.b32.xlu0 %v700_v4, %s747_s25 }
  0x19   : > { %716 = vrot.lane.b32.xlu1 %v710_v7, %s747_s25  ;;  %660 = vmatpush3.bf16.msra.mxu0 %v657_v8 }
  0x1c   : > { %632 = vmatmul.mubr.msk.f32.vlgmr.msra.gmra.mrb[0].mxu0 %vm216_vm0, %v196_v11  ;;  %481 = vperm.xlu0 %720, %v477_v12  }
  0x1d   : > { %642 = vmatprep.mubr.msk.f32.mxu0 %vm216_vm0, %v586_v13  ;;  %486 = vperm.xlu1 %721, %v478_v14  }
  0x86   : > { %v702_v15 = vpop.permute.xlu0 %701 }
  0x87   : > { %v704_v16 = vunpack.i.h.bf16 %v702_v15  ;;  %v703_v17 = vunpack.i.l.bf16 %v702_v15  ;;  %v712_v18 = vpop.permute.xlu1 %711 }
  0x88   : > { %v714_v19 = vunpack.i.h.bf16 %v712_v18  ;;  %v713_v20 = vunpack.i.l.bf16 %v712_v18 }
  0x89   : > { %v645_v21 = vpack.c.bf16 %v704_v16, %v703_v17 }
  0x8a   : > { %v649_v22 = vpack.c.bf16 %v714_v19, %v713_v20  ;;  %v707_v23 = vpop.permute.xlu0 %706 }
  0x8b   : > { %v709_v24 = vunpack.i.h.bf16 %v707_v23  ;;  %v708_v25 = vunpack.i.l.bf16 %v707_v23  ;;  %646 = vmatprep.subr.bf16.mxu1 %v645_v21  ;;  %v717_v26 = vpop.permute.xlu1 %716 }
  0x8c   : > { %648 = vmatpush3.bf16.msra.mxu1 %v645_v21  ;;  %v719_v27 = vunpack.i.h.bf16 %v717_v26  ;;  %v718_v28 = vunpack.i.l.bf16 %v717_v26 }
  0x8d   : > { %v661_v29 = vpack.c.bf16 %v709_v24, %v708_v25  ;;  %650 = vmatprep.subr.bf16.mxu1 %v649_v22 }
  0x8e   : > { %v665_v30 = vpack.c.bf16 %v719_v27, %v718_v28 }
  0x8f   : > { %662 = vmatprep.subr.bf16.mxu0 %v661_v29 }
  0x90   : > { %652 = vmatpush3.bf16.msra.mxu1 %v649_v22  ;;  %664 = vmatpush3.bf16.msra.mxu0 %v661_v29 }
  0x91   : > { %666 = vmatprep.subr.bf16.mxu0 %v665_v30 }
  0x93   : > { %621 = vmatmul.mubr.msk.f32.vlgmr.msra.gmra.mrb[0].mxu1 %vm216_vm0, %v581_v31 }
  0x94   : > { %668 = vmatpush3.bf16.msra.mxu0 %v665_v30 }
  0x97   : > { %643 = vmatmul.mubr.msk.f32.vlgmr.msra.gmra.mrb[0].mxu0 %vm216_vm0, %v587_v32 }
  0x9b   : > { %v482_v39 = vpop.permute.xlu0 %481 }
  0x9c   : > { %v487_v36 = vpop.permute.xlu1 %486 }
 0x166   : > { %v622_v33 = vpop.f32.mrb[0].mxu1 }
 0x167   : > { %v289_v34 = vpop.f32.mrb[1].mxu1 }
 0x16a   : > { %v644_v35 = vpop.f32.mrb[0].mxu0 }
 0x16b   : > { %v669_v37 = vadd.f32 %v644_v35, %v622_v33  ;;  %v466_v38 = vpop.f32.mrb[1].mxu0 }
 0x16c   : > { %v670_v40 = vadd.f32 %v466_v38, %v289_v34 }
 0x16d   : > { %v490_v41 = vadd.f32 %v669_v37, %v487_v36 }
 0x16e   : > { %v489_v42 = vadd.f32 %v670_v40, %v482_v39 }
 0x16f   : > { %493 = vst.msk [vmem:[%s190_s18 + $0x8] sm:$0xff] %vm491_vm1, %v490_v41 }
 0x170   : > { %492 = vst.msk [vmem:[%s190_s18] sm:$0xff] %vm491_vm1, %v489_v42 }
 0x171 PF: > { %s13_s14 = sadd.s32 1, %s744_s14   ;;  %s840_s12 = smov %s740_s13 }
 0x172   : > { %p10_p5 = scmp.ge.s32.totalorder %s13_s14, 4   ;;  %s841_s13 = smov %s843_s15 }
 0x174   :  { %12 = sbr.rel (!%p10_p5) target bundleno = 2 (0x2), region = 64 }

</bundles_post_ra>
